<compile_context>
chip_gen: v6e
topology: v6e:2x2x1
jax: 0.10.0
libtpu: 0.0.40
codegen_flags: <defaults>
</compile_context>

<pallas_src>
import math
import functools

import jax
import jax.numpy as jnp
import numpy as np
from jax.experimental import pallas as pl
from jax.experimental.pallas import tpu as pltpu


# ----------------------------------------------------------------------------
# Deterministic gaussian orthogonal random matrix (mirrors the torch version)
# ----------------------------------------------------------------------------
def orthogonal_matrix_chunk(key, cols):
    unstructured = jax.random.normal(key, (cols, cols), dtype=jnp.float32)
    q, _ = jnp.linalg.qr(unstructured)          # reduced QR
    return q.T


def gaussian_orthogonal_random_matrix(key, nb_rows, nb_columns, scaling=0):
    nb_full_blocks = nb_rows // nb_columns
    keys = jax.random.split(key, nb_full_blocks + 2)
    blocks = []
    for i in range(nb_full_blocks):
        blocks.append(orthogonal_matrix_chunk(keys[i], nb_columns))
    remaining = nb_rows - nb_full_blocks * nb_columns
    if remaining > 0:
        q = orthogonal_matrix_chunk(keys[nb_full_blocks], nb_columns)
        blocks.append(q[:remaining])
    final_matrix = jnp.concatenate(blocks, axis=0)
    if scaling == 0:
        multiplier = jnp.linalg.norm(
            jax.random.normal(keys[-1], (nb_rows, nb_columns), dtype=jnp.float32),
            axis=1,
        )
    elif scaling == 1:
        multiplier = math.sqrt(float(nb_columns)) * jnp.ones((nb_rows,), jnp.float32)
    else:
        raise ValueError(f"Invalid scaling {scaling}")
    return multiplier[:, None] * final_matrix      # diag(multiplier) @ final_matrix


# ----------------------------------------------------------------------------
# Pallas kernel: Hb heads per grid step, lane-dense output slab
# ----------------------------------------------------------------------------
def _fast_attention_kernel(q_ref, k_ref, v_ref, projt_ref, o_ref, *,
                           eps, m_real, n_per_head, heads_per_block,
                           ratio, diag_scale):
    # q_ref/k_ref/v_ref: (Hb*N, D)   projt_ref: (D, Mp) pre-scaled by d**-0.25
    # o_ref: (N, Hb*D)  -- heads concatenated along lanes
    q = q_ref[...].astype(jnp.float32)
    k = k_ref[...].astype(jnp.float32)
    v = v_ref[...].astype(jnp.float32)
    projt = projt_ref[...].astype(jnp.float32)

    mp = projt.shape[-1]

    # Feature-map matmuls: one big MXU matmul covering all heads in the block.
    q_dash = jnp.dot(q, projt, preferred_element_type=jnp.float32)    # (Hb*N, Mp)
    k_dash = jnp.dot(k, projt, preferred_element_type=jnp.float32)    # (Hb*N, Mp)

    q_diag = jnp.sum(q * q, axis=-1, keepdims=True) * diag_scale      # (Hb*N, 1)
    k_diag = jnp.sum(k * k, axis=-1, keepdims=True) * diag_scale      # (Hb*N, 1)

    # Mask for the padded feature columns (M was rounded up to a multiple of 128).
    col = jax.lax.broadcasted_iota(jnp.int32, (1, mp), 1)
    valid = col < m_real                                               # (1, Mp)
    neg_inf = jnp.float32(-jnp.inf)

    # q': row-wise max over the *real* feature columns only.
    q_max = jnp.max(jnp.where(valid, q_dash, neg_inf), axis=-1, keepdims=True)
    q_prime = ratio * (jnp.exp(q_dash - q_diag - q_max) + eps)
    q_prime = jnp.where(valid, q_prime, 0.0)                           # (Hb*N, Mp)

    k_dash_masked = jnp.where(valid, k_dash, neg_inf)

    outs = []
    for h in range(heads_per_block):                                   # short static unroll
        rows = slice(h * n_per_head, (h + 1) * n_per_head)

        # k': per-head global max over (N, M_real).
        kd_h = k_dash[rows]                                            # (N, Mp)
        kmax_h = jnp.max(k_dash_masked[rows])                          # scalar
        kp_h = ratio * (jnp.exp(kd_h - k_diag[rows] - kmax_h) + eps)
        kp_h = jnp.where(valid, kp_h, 0.0)                             # (N, Mp)

        qp_h = q_prime[rows]                                           # (N, Mp)
        v_h = v[rows]                                                  # (N, D)

        # Denominator on the VPU (no 1-wide MXU matmul, no k_cumsum transpose),
        # reciprocal on the otherwise-idle EUP slot.
        ksum_h = jnp.sum(kp_h, axis=0, keepdims=True)                  # (1, Mp)
        denom_h = jnp.sum(qp_h * ksum_h, axis=-1, keepdims=True)       # (N, 1)
        dinv_h = pl.reciprocal(denom_h, approx=True)

        # context = k'^T @ v without materializing the transpose.
        ctx_h = jax.lax.dot_general(
            kp_h, v_h,
            dimension_numbers=(((0,), (0,)), ((), ())),
            preferred_element_type=jnp.float32)                        # (Mp, D)
        out_h = jnp.dot(qp_h, ctx_h,
                        preferred_element_type=jnp.float32) * dinv_h   # (N, D)
        outs.append(out_h)

    # Lane-dense writeback: (N, Hb*D) slab, unmasked stores when Hb*D >= 128.
    o_ref[...] = jnp.concatenate(outs, axis=-1).astype(o_ref.dtype)


def _pick_heads_per_block(num_heads, dim_head):
    """Smallest divisor of num_heads giving a lane-dense (>=128) output slab."""
    want = min(num_heads, max(1, math.ceil(128 / dim_head)))
    for cand in range(want, num_heads + 1):
        if num_heads % cand == 0:
            return cand
    return num_heads


def fast_attention(q, k, v, projection_matrix, *, eps=1e-4, heads_per_block=None):
    """q, k, v: (B, H, N, D) float32; projection_matrix: (M, D)."""
    B, H, N, D = q.shape
    M = projection_matrix.shape[0]
    BH = B * H

    if heads_per_block is None:
        heads_per_block = _pick_heads_per_block(BH, D)
    assert BH % heads_per_block == 0
    G = BH // heads_per_block
    row_block = heads_per_block * N

    # Pad nb_features up to a multiple of 128 (padded columns masked in-kernel).
    Mp = ((M + 127) // 128) * 128

    # One-time hoist: pre-scale (d**-0.25) and pre-transpose the shared projection.
    dn = D ** (-0.25)
    proj_t = (dn * projection_matrix.astype(jnp.float32)).T            # (D, M)
    if Mp != M:
        proj_t = jnp.pad(proj_t, ((0, 0), (0, Mp - M)))                # (D, Mp)

    qf = q.reshape(BH * N, D)
    kf = k.reshape(BH * N, D)
    vf = v.reshape(BH * N, D)

    kernel = functools.partial(
        _fast_attention_kernel,
        eps=eps, m_real=M, n_per_head=N, heads_per_block=heads_per_block,
        ratio=M ** (-0.5), diag_scale=0.5 * (D ** (-0.5)))

    qkv_spec = pl.BlockSpec((row_block, D), lambda i: (i, 0))
    proj_spec = pl.BlockSpec((D, Mp), lambda i: (0, 0))
    out_spec = pl.BlockSpec((N, heads_per_block * D), lambda i: (i, 0))

    out = pl.pallas_call(
        kernel,
        out_shape=jax.ShapeDtypeStruct((G * N, heads_per_block * D), q.dtype),
        grid_spec=pltpu.PrefetchScalarGridSpec(
            num_scalar_prefetch=0,
            grid=(G,),
            in_specs=[qkv_spec, qkv_spec, qkv_spec, proj_spec],
            out_specs=out_spec,
        ),
        compiler_params=pltpu.CompilerParams(
            dimension_semantics=("parallel",)),
    )(qf, kf, vf, proj_t)

    # Un-interleave the lane-dense output: (G*N, Hb*D) -> (B, H, N, D).
    out = out.reshape(G, N, heads_per_block, D)
    out = jnp.transpose(out, (0, 2, 1, 3)).reshape(B, H, N, D)
    return out


# ----------------------------------------------------------------------------
# Pure-JAX reference (mirrors the PyTorch module) for validation
# ----------------------------------------------------------------------------
def _reference(q, k, v, proj, eps=1e-4):
    d = q.shape[-1]
    m = proj.shape[0]
    dn = d ** (-0.25)
    ratio = m ** (-0.5)

    def feat(x, is_query):
        dash = jnp.einsum("bhnd,md->bhnm", dn * x, proj)
        diag = jnp.sum(x * x, -1, keepdims=True) * 0.5 * dn ** 2
        if is_query:
            mx = jnp.max(dash, axis=-1, keepdims=True)
        else:
            mx = jnp.max(dash, axis=(-1, -2), keepdims=True)
        return ratio * (jnp.exp(dash - diag - mx) + eps)

    qp = feat(q, True)
    kp = feat(k, False)
    k_cumsum = kp.sum(-2)
    d_inv = 1.0 / jnp.einsum("bhnm,bhm->bhn", qp, k_cumsum)
    context = jnp.einsum("bhnm,bhne->bhme", kp, v)
    return jnp.einsum("bhme,bhnm,bhn->bhne", context, qp, d_inv)


if __name__ == "__main__":
    B, H, N, DIM_HEADS = 2, 2, 8, 32
    NB_FEATURES = int(DIM_HEADS * math.log(DIM_HEADS))  # 110, matches default()

    key = jax.random.PRNGKey(0)
    kq, kk, kv, kp = jax.random.split(key, 4)
    q = jax.random.normal(kq, (B, H, N, DIM_HEADS), dtype=jnp.float32)
    k = jax.random.normal(kk, (B, H, N, DIM_HEADS), dtype=jnp.float32)
    v = jax.random.normal(kv, (B, H, N, DIM_HEADS), dtype=jnp.float32)

    projection_matrix = gaussian_orthogonal_random_matrix(
        kp, NB_FEATURES, DIM_HEADS, scaling=0)

    out = fast_attention(q, k, v, projection_matrix)
    out = jax.block_until_ready(out)

    ref = _reference(q, k, v, projection_matrix)
    # Tolerance is 1e-2 (instead of 1e-4) solely to accommodate the EUP
    # approximate reciprocal used for 1/denominator; everything else is f32.
    np.testing.assert_allclose(np.asarray(out), np.asarray(ref),
                               rtol=1e-2, atol=1e-2)
    print("KERNEL_OK")
</pallas_src>

<mosaic_0001>
module attributes {stable_mosaic.version = 11 : i64} {
  func.func @_fast_attention_kernel(%arg0: i32, %arg1: memref<32x32xf32, #tpu.memory_space<vmem>>, %arg2: memref<32x32xf32, #tpu.memory_space<vmem>>, %arg3: memref<32x32xf32, #tpu.memory_space<vmem>>, %arg4: memref<32x128xf32, #tpu.memory_space<vmem>>, %arg5: memref<8x128xf32, #tpu.memory_space<vmem>>) attributes {dimension_semantics = [#tpu.dimension_semantics<parallel>], iteration_bounds = array<i64: 1>, scalar_prefetch = 0 : i64, scratch_operands = 0 : i64, tpu.core_type = #tpu.core_type<tc>, window_params = [{transform_indices = @transform_0, window_bounds = array<i64: 32, 32>}, {transform_indices = @transform_1, window_bounds = array<i64: 32, 32>}, {transform_indices = @transform_2, window_bounds = array<i64: 32, 32>}, {pipeline_mode = #tpu.pipeline_mode<synchronous>, transform_indices = @transform_3, window_bounds = array<i64: 32, 128>}, {transform_indices = @transform_4, window_bounds = array<i64: 8, 128>}]} {
    %c0 = arith.constant 0 : index
    %c0_0 = arith.constant 0 : index
    %0 = vector.load %arg1[%c0, %c0_0] : memref<32x32xf32, #tpu.memory_space<vmem>>, vector<32x32xf32>
    %c0_1 = arith.constant 0 : index
    %c0_2 = arith.constant 0 : index
    %1 = vector.load %arg2[%c0_1, %c0_2] : memref<32x32xf32, #tpu.memory_space<vmem>>, vector<32x32xf32>
    %c0_3 = arith.constant 0 : index
    %c0_4 = arith.constant 0 : index
    %2 = vector.load %arg3[%c0_3, %c0_4] : memref<32x32xf32, #tpu.memory_space<vmem>>, vector<32x32xf32>
    %c0_5 = arith.constant 0 : index
    %c0_6 = arith.constant 0 : index
    %3 = vector.load %arg4[%c0_5, %c0_6] : memref<32x128xf32, #tpu.memory_space<vmem>>, vector<32x128xf32>
    %cst = arith.constant dense<0.000000e+00> : vector<32x128xf32>
    %4 = tpu.matmul %0, %3, %cst {dimension_numbers = #tpu.dot_dimension_numbers<[1], [0], [0], [1], [0, 0, 1, 1], [], []>} : vector<32x32xf32>, vector<32x128xf32>, vector<32x128xf32> -> vector<32x128xf32>
    %cst_7 = arith.constant dense<0.000000e+00> : vector<32x128xf32>
    %5 = tpu.matmul %1, %3, %cst_7 {dimension_numbers = #tpu.dot_dimension_numbers<[1], [0], [0], [1], [0, 0, 1, 1], [], []>} : vector<32x32xf32>, vector<32x128xf32>, vector<32x128xf32> -> vector<32x128xf32>
    %6 = arith.mulf %0, %0 : vector<32x32xf32>
    %cst_8 = arith.constant dense<0.000000e+00> : vector<32xf32>
    %7 = vector.multi_reduction <add>, %6, %cst_8 [1] : vector<32x32xf32> to vector<32xf32>
    %8 = vector.shape_cast %7 : vector<32xf32> to vector<32x1xf32>
    %cst_9 = arith.constant 0.0883883461 : f32
    %9 = vector.broadcast %cst_9 : f32 to vector<32x1xf32>
    %10 = arith.mulf %8, %9 : vector<32x1xf32>
    %11 = arith.mulf %1, %1 : vector<32x32xf32>
    %cst_10 = arith.constant dense<0.000000e+00> : vector<32xf32>
    %12 = vector.multi_reduction <add>, %11, %cst_10 [1] : vector<32x32xf32> to vector<32xf32>
    %13 = vector.shape_cast %12 : vector<32xf32> to vector<32x1xf32>
    %cst_11 = arith.constant 0.0883883461 : f32
    %14 = vector.broadcast %cst_11 : f32 to vector<32x1xf32>
    %15 = arith.mulf %13, %14 : vector<32x1xf32>
    %16 = tpu.iota {dimensions = array<i32: 1>} : vector<1x128xi32>
    %c110_i32 = arith.constant 110 : i32
    %17 = vector.broadcast %c110_i32 : i32 to vector<1x128xi32>
    %18 = arith.cmpi slt, %16, %17 : vector<1x128xi32>
    %cst_12 = arith.constant 0xFF800000 : f32
    %19 = vector.shape_cast %18 : vector<1x128xi1> to vector<1x128xi1>
    %20 = vector.broadcast %19 : vector<1x128xi1> to vector<32x128xi1>
    %21 = vector.broadcast %cst_12 : f32 to vector<32x128xf32>
    %22 = arith.select %20, %4, %21 : vector<32x128xi1>, vector<32x128xf32>
    %cst_13 = arith.constant dense<0xFF800000> : vector<32xf32>
    %23 = vector.multi_reduction <maximumf>, %22, %cst_13 [1] : vector<32x128xf32> to vector<32xf32>
    %24 = vector.shape_cast %23 : vector<32xf32> to vector<32x1xf32>
    %25 = vector.broadcast %10 : vector<32x1xf32> to vector<32x128xf32>
    %26 = arith.subf %4, %25 : vector<32x128xf32>
    %27 = vector.broadcast %24 : vector<32x1xf32> to vector<32x128xf32>
    %28 = arith.subf %26, %27 : vector<32x128xf32>
    %29 = math.exp %28 : vector<32x128xf32>
    %cst_14 = arith.constant 9.99999974E-5 : f32
    %30 = vector.broadcast %cst_14 : f32 to vector<32x128xf32>
    %31 = arith.addf %29, %30 : vector<32x128xf32>
    %cst_15 = arith.constant 0.0953462571 : f32
    %32 = vector.broadcast %cst_15 : f32 to vector<32x128xf32>
    %33 = arith.mulf %32, %31 : vector<32x128xf32>
    %cst_16 = arith.constant 0.000000e+00 : f32
    %34 = vector.shape_cast %18 : vector<1x128xi1> to vector<1x128xi1>
    %35 = vector.broadcast %34 : vector<1x128xi1> to vector<32x128xi1>
    %36 = vector.broadcast %cst_16 : f32 to vector<32x128xf32>
    %37 = arith.select %35, %33, %36 : vector<32x128xi1>, vector<32x128xf32>
    %cst_17 = arith.constant 0xFF800000 : f32
    %38 = vector.shape_cast %18 : vector<1x128xi1> to vector<1x128xi1>
    %39 = vector.broadcast %38 : vector<1x128xi1> to vector<32x128xi1>
    %40 = vector.broadcast %cst_17 : f32 to vector<32x128xf32>
    %41 = arith.select %39, %5, %40 : vector<32x128xi1>, vector<32x128xf32>
    %42 = vector.extract_strided_slice %5 {offsets = [0, 0], sizes = [8, 128], strides = [1, 1]} : vector<32x128xf32> to vector<8x128xf32>
    %43 = vector.extract_strided_slice %41 {offsets = [0, 0], sizes = [8, 128], strides = [1, 1]} : vector<32x128xf32> to vector<8x128xf32>
    %44 = vector.shape_cast %43 : vector<8x128xf32> to vector<1x8x128xf32>
    %cst_18 = arith.constant dense<0xFF800000> : vector<1xf32>
    %45 = vector.multi_reduction <maximumf>, %44, %cst_18 [1, 2] : vector<1x8x128xf32> to vector<1xf32>
    %46 = vector.shape_cast %45 : vector<1xf32> to vector<1x1x1xf32>
    %47 = vector.extract %46[0, 0, 0] : f32 from vector<1x1x1xf32>
    %48 = vector.extract_strided_slice %15 {offsets = [0, 0], sizes = [8, 1], strides = [1, 1]} : vector<32x1xf32> to vector<8x1xf32>
    %49 = vector.broadcast %48 : vector<8x1xf32> to vector<8x128xf32>
    %50 = arith.subf %42, %49 : vector<8x128xf32>
    %51 = vector.broadcast %47 : f32 to vector<8x128xf32>
    %52 = arith.subf %50, %51 : vector<8x128xf32>
    %53 = math.exp %52 : vector<8x128xf32>
    %cst_19 = arith.constant 9.99999974E-5 : f32
    %54 = vector.broadcast %cst_19 : f32 to vector<8x128xf32>
    %55 = arith.addf %53, %54 : vector<8x128xf32>
    %cst_20 = arith.constant 0.0953462571 : f32
    %56 = vector.broadcast %cst_20 : f32 to vector<8x128xf32>
    %57 = arith.mulf %56, %55 : vector<8x128xf32>
    %cst_21 = arith.constant 0.000000e+00 : f32
    %58 = vector.shape_cast %18 : vector<1x128xi1> to vector<1x128xi1>
    %59 = vector.broadcast %58 : vector<1x128xi1> to vector<8x128xi1>
    %60 = vector.broadcast %cst_21 : f32 to vector<8x128xf32>
    %61 = arith.select %59, %57, %60 : vector<8x128xi1>, vector<8x128xf32>
    %62 = vector.extract_strided_slice %37 {offsets = [0, 0], sizes = [8, 128], strides = [1, 1]} : vector<32x128xf32> to vector<8x128xf32>
    %63 = vector.extract_strided_slice %2 {offsets = [0, 0], sizes = [8, 32], strides = [1, 1]} : vector<32x32xf32> to vector<8x32xf32>
    %cst_22 = arith.constant dense<0.000000e+00> : vector<128xf32>
    %64 = vector.multi_reduction <add>, %61, %cst_22 [0] : vector<8x128xf32> to vector<128xf32>
    %65 = vector.shape_cast %64 : vector<128xf32> to vector<1x128xf32>
    %66 = vector.broadcast %65 : vector<1x128xf32> to vector<8x128xf32>
    %67 = arith.mulf %62, %66 : vector<8x128xf32>
    %cst_23 = arith.constant dense<0.000000e+00> : vector<8xf32>
    %68 = vector.multi_reduction <add>, %67, %cst_23 [1] : vector<8x128xf32> to vector<8xf32>
    %69 = vector.shape_cast %68 : vector<8xf32> to vector<8x1xf32>
    %70 = tpu.reciprocal %69 {approx = true} : vector<8x1xf32> -> vector<8x1xf32>
    %cst_24 = arith.constant dense<0.000000e+00> : vector<128x32xf32>
    %71 = tpu.matmul %61, %63, %cst_24 {dimension_numbers = #tpu.dot_dimension_numbers<[0], [0], [1], [1], [0, 1, 1, 1], [], []>} : vector<8x128xf32>, vector<8x32xf32>, vector<128x32xf32> -> vector<128x32xf32>
    %cst_25 = arith.constant dense<0.000000e+00> : vector<8x32xf32>
    %72 = tpu.matmul %62, %71, %cst_25 {dimension_numbers = #tpu.dot_dimension_numbers<[1], [0], [0], [1], [0, 0, 1, 1], [], []>} : vector<8x128xf32>, vector<128x32xf32>, vector<8x32xf32> -> vector<8x32xf32>
    %73 = vector.broadcast %70 : vector<8x1xf32> to vector<8x32xf32>
    %74 = arith.mulf %72, %73 : vector<8x32xf32>
    %75 = vector.extract_strided_slice %5 {offsets = [8, 0], sizes = [8, 128], strides = [1, 1]} : vector<32x128xf32> to vector<8x128xf32>
    %76 = vector.extract_strided_slice %41 {offsets = [8, 0], sizes = [8, 128], strides = [1, 1]} : vector<32x128xf32> to vector<8x128xf32>
    %77 = vector.shape_cast %76 : vector<8x128xf32> to vector<1x8x128xf32>
    %cst_26 = arith.constant dense<0xFF800000> : vector<1xf32>
    %78 = vector.multi_reduction <maximumf>, %77, %cst_26 [1, 2] : vector<1x8x128xf32> to vector<1xf32>
    %79 = vector.shape_cast %78 : vector<1xf32> to vector<1x1x1xf32>
    %80 = vector.extract %79[0, 0, 0] : f32 from vector<1x1x1xf32>
    %81 = vector.extract_strided_slice %15 {offsets = [8, 0], sizes = [8, 1], strides = [1, 1]} : vector<32x1xf32> to vector<8x1xf32>
    %82 = vector.broadcast %81 : vector<8x1xf32> to vector<8x128xf32>
    %83 = arith.subf %75, %82 : vector<8x128xf32>
    %84 = vector.broadcast %80 : f32 to vector<8x128xf32>
    %85 = arith.subf %83, %84 : vector<8x128xf32>
    %86 = math.exp %85 : vector<8x128xf32>
    %cst_27 = arith.constant 9.99999974E-5 : f32
    %87 = vector.broadcast %cst_27 : f32 to vector<8x128xf32>
    %88 = arith.addf %86, %87 : vector<8x128xf32>
    %cst_28 = arith.constant 0.0953462571 : f32
    %89 = vector.broadcast %cst_28 : f32 to vector<8x128xf32>
    %90 = arith.mulf %89, %88 : vector<8x128xf32>
    %cst_29 = arith.constant 0.000000e+00 : f32
    %91 = vector.shape_cast %18 : vector<1x128xi1> to vector<1x128xi1>
    %92 = vector.broadcast %91 : vector<1x128xi1> to vector<8x128xi1>
    %93 = vector.broadcast %cst_29 : f32 to vector<8x128xf32>
    %94 = arith.select %92, %90, %93 : vector<8x128xi1>, vector<8x128xf32>
    %95 = vector.extract_strided_slice %37 {offsets = [8, 0], sizes = [8, 128], strides = [1, 1]} : vector<32x128xf32> to vector<8x128xf32>
    %96 = vector.extract_strided_slice %2 {offsets = [8, 0], sizes = [8, 32], strides = [1, 1]} : vector<32x32xf32> to vector<8x32xf32>
    %cst_30 = arith.constant dense<0.000000e+00> : vector<128xf32>
    %97 = vector.multi_reduction <add>, %94, %cst_30 [0] : vector<8x128xf32> to vector<128xf32>
    %98 = vector.shape_cast %97 : vector<128xf32> to vector<1x128xf32>
    %99 = vector.broadcast %98 : vector<1x128xf32> to vector<8x128xf32>
    %100 = arith.mulf %95, %99 : vector<8x128xf32>
    %cst_31 = arith.constant dense<0.000000e+00> : vector<8xf32>
    %101 = vector.multi_reduction <add>, %100, %cst_31 [1] : vector<8x128xf32> to vector<8xf32>
    %102 = vector.shape_cast %101 : vector<8xf32> to vector<8x1xf32>
    %103 = tpu.reciprocal %102 {approx = true} : vector<8x1xf32> -> vector<8x1xf32>
    %cst_32 = arith.constant dense<0.000000e+00> : vector<128x32xf32>
    %104 = tpu.matmul %94, %96, %cst_32 {dimension_numbers = #tpu.dot_dimension_numbers<[0], [0], [1], [1], [0, 1, 1, 1], [], []>} : vector<8x128xf32>, vector<8x32xf32>, vector<128x32xf32> -> vector<128x32xf32>
    %cst_33 = arith.constant dense<0.000000e+00> : vector<8x32xf32>
    %105 = tpu.matmul %95, %104, %cst_33 {dimension_numbers = #tpu.dot_dimension_numbers<[1], [0], [0], [1], [0, 0, 1, 1], [], []>} : vector<8x128xf32>, vector<128x32xf32>, vector<8x32xf32> -> vector<8x32xf32>
    %106 = vector.broadcast %103 : vector<8x1xf32> to vector<8x32xf32>
    %107 = arith.mulf %105, %106 : vector<8x32xf32>
    %108 = vector.extract_strided_slice %5 {offsets = [16, 0], sizes = [8, 128], strides = [1, 1]} : vector<32x128xf32> to vector<8x128xf32>
    %109 = vector.extract_strided_slice %41 {offsets = [16, 0], sizes = [8, 128], strides = [1, 1]} : vector<32x128xf32> to vector<8x128xf32>
    %110 = vector.shape_cast %109 : vector<8x128xf32> to vector<1x8x128xf32>
    %cst_34 = arith.constant dense<0xFF800000> : vector<1xf32>
    %111 = vector.multi_reduction <maximumf>, %110, %cst_34 [1, 2] : vector<1x8x128xf32> to vector<1xf32>
    %112 = vector.shape_cast %111 : vector<1xf32> to vector<1x1x1xf32>
    %113 = vector.extract %112[0, 0, 0] : f32 from vector<1x1x1xf32>
    %114 = vector.extract_strided_slice %15 {offsets = [16, 0], sizes = [8, 1], strides = [1, 1]} : vector<32x1xf32> to vector<8x1xf32>
    %115 = vector.broadcast %114 : vector<8x1xf32> to vector<8x128xf32>
    %116 = arith.subf %108, %115 : vector<8x128xf32>
    %117 = vector.broadcast %113 : f32 to vector<8x128xf32>
    %118 = arith.subf %116, %117 : vector<8x128xf32>
    %119 = math.exp %118 : vector<8x128xf32>
    %cst_35 = arith.constant 9.99999974E-5 : f32
    %120 = vector.broadcast %cst_35 : f32 to vector<8x128xf32>
    %121 = arith.addf %119, %120 : vector<8x128xf32>
    %cst_36 = arith.constant 0.0953462571 : f32
    %122 = vector.broadcast %cst_36 : f32 to vector<8x128xf32>
    %123 = arith.mulf %122, %121 : vector<8x128xf32>
    %cst_37 = arith.constant 0.000000e+00 : f32
    %124 = vector.shape_cast %18 : vector<1x128xi1> to vector<1x128xi1>
    %125 = vector.broadcast %124 : vector<1x128xi1> to vector<8x128xi1>
    %126 = vector.broadcast %cst_37 : f32 to vector<8x128xf32>
    %127 = arith.select %125, %123, %126 : vector<8x128xi1>, vector<8x128xf32>
    %128 = vector.extract_strided_slice %37 {offsets = [16, 0], sizes = [8, 128], strides = [1, 1]} : vector<32x128xf32> to vector<8x128xf32>
    %129 = vector.extract_strided_slice %2 {offsets = [16, 0], sizes = [8, 32], strides = [1, 1]} : vector<32x32xf32> to vector<8x32xf32>
    %cst_38 = arith.constant dense<0.000000e+00> : vector<128xf32>
    %130 = vector.multi_reduction <add>, %127, %cst_38 [0] : vector<8x128xf32> to vector<128xf32>
    %131 = vector.shape_cast %130 : vector<128xf32> to vector<1x128xf32>
    %132 = vector.broadcast %131 : vector<1x128xf32> to vector<8x128xf32>
    %133 = arith.mulf %128, %132 : vector<8x128xf32>
    %cst_39 = arith.constant dense<0.000000e+00> : vector<8xf32>
    %134 = vector.multi_reduction <add>, %133, %cst_39 [1] : vector<8x128xf32> to vector<8xf32>
    %135 = vector.shape_cast %134 : vector<8xf32> to vector<8x1xf32>
    %136 = tpu.reciprocal %135 {approx = true} : vector<8x1xf32> -> vector<8x1xf32>
    %cst_40 = arith.constant dense<0.000000e+00> : vector<128x32xf32>
    %137 = tpu.matmul %127, %129, %cst_40 {dimension_numbers = #tpu.dot_dimension_numbers<[0], [0], [1], [1], [0, 1, 1, 1], [], []>} : vector<8x128xf32>, vector<8x32xf32>, vector<128x32xf32> -> vector<128x32xf32>
    %cst_41 = arith.constant dense<0.000000e+00> : vector<8x32xf32>
    %138 = tpu.matmul %128, %137, %cst_41 {dimension_numbers = #tpu.dot_dimension_numbers<[1], [0], [0], [1], [0, 0, 1, 1], [], []>} : vector<8x128xf32>, vector<128x32xf32>, vector<8x32xf32> -> vector<8x32xf32>
    %139 = vector.broadcast %136 : vector<8x1xf32> to vector<8x32xf32>
    %140 = arith.mulf %138, %139 : vector<8x32xf32>
    %141 = vector.extract_strided_slice %5 {offsets = [24, 0], sizes = [8, 128], strides = [1, 1]} : vector<32x128xf32> to vector<8x128xf32>
    %142 = vector.extract_strided_slice %41 {offsets = [24, 0], sizes = [8, 128], strides = [1, 1]} : vector<32x128xf32> to vector<8x128xf32>
    %143 = vector.shape_cast %142 : vector<8x128xf32> to vector<1x8x128xf32>
    %cst_42 = arith.constant dense<0xFF800000> : vector<1xf32>
    %144 = vector.multi_reduction <maximumf>, %143, %cst_42 [1, 2] : vector<1x8x128xf32> to vector<1xf32>
    %145 = vector.shape_cast %144 : vector<1xf32> to vector<1x1x1xf32>
    %146 = vector.extract %145[0, 0, 0] : f32 from vector<1x1x1xf32>
    %147 = vector.extract_strided_slice %15 {offsets = [24, 0], sizes = [8, 1], strides = [1, 1]} : vector<32x1xf32> to vector<8x1xf32>
    %148 = vector.broadcast %147 : vector<8x1xf32> to vector<8x128xf32>
    %149 = arith.subf %141, %148 : vector<8x128xf32>
    %150 = vector.broadcast %146 : f32 to vector<8x128xf32>
    %151 = arith.subf %149, %150 : vector<8x128xf32>
    %152 = math.exp %151 : vector<8x128xf32>
    %cst_43 = arith.constant 9.99999974E-5 : f32
    %153 = vector.broadcast %cst_43 : f32 to vector<8x128xf32>
    %154 = arith.addf %152, %153 : vector<8x128xf32>
    %cst_44 = arith.constant 0.0953462571 : f32
    %155 = vector.broadcast %cst_44 : f32 to vector<8x128xf32>
    %156 = arith.mulf %155, %154 : vector<8x128xf32>
    %cst_45 = arith.constant 0.000000e+00 : f32
    %157 = vector.shape_cast %18 : vector<1x128xi1> to vector<1x128xi1>
    %158 = vector.broadcast %157 : vector<1x128xi1> to vector<8x128xi1>
    %159 = vector.broadcast %cst_45 : f32 to vector<8x128xf32>
    %160 = arith.select %158, %156, %159 : vector<8x128xi1>, vector<8x128xf32>
    %161 = vector.extract_strided_slice %37 {offsets = [24, 0], sizes = [8, 128], strides = [1, 1]} : vector<32x128xf32> to vector<8x128xf32>
    %162 = vector.extract_strided_slice %2 {offsets = [24, 0], sizes = [8, 32], strides = [1, 1]} : vector<32x32xf32> to vector<8x32xf32>
    %cst_46 = arith.constant dense<0.000000e+00> : vector<128xf32>
    %163 = vector.multi_reduction <add>, %160, %cst_46 [0] : vector<8x128xf32> to vector<128xf32>
    %164 = vector.shape_cast %163 : vector<128xf32> to vector<1x128xf32>
    %165 = vector.broadcast %164 : vector<1x128xf32> to vector<8x128xf32>
    %166 = arith.mulf %161, %165 : vector<8x128xf32>
    %cst_47 = arith.constant dense<0.000000e+00> : vector<8xf32>
    %167 = vector.multi_reduction <add>, %166, %cst_47 [1] : vector<8x128xf32> to vector<8xf32>
    %168 = vector.shape_cast %167 : vector<8xf32> to vector<8x1xf32>
    %169 = tpu.reciprocal %168 {approx = true} : vector<8x1xf32> -> vector<8x1xf32>
    %cst_48 = arith.constant dense<0.000000e+00> : vector<128x32xf32>
    %170 = tpu.matmul %160, %162, %cst_48 {dimension_numbers = #tpu.dot_dimension_numbers<[0], [0], [1], [1], [0, 1, 1, 1], [], []>} : vector<8x128xf32>, vector<8x32xf32>, vector<128x32xf32> -> vector<128x32xf32>
    %cst_49 = arith.constant dense<0.000000e+00> : vector<8x32xf32>
    %171 = tpu.matmul %161, %170, %cst_49 {dimension_numbers = #tpu.dot_dimension_numbers<[1], [0], [0], [1], [0, 0, 1, 1], [], []>} : vector<8x128xf32>, vector<128x32xf32>, vector<8x32xf32> -> vector<8x32xf32>
    %172 = vector.broadcast %169 : vector<8x1xf32> to vector<8x32xf32>
    %173 = arith.mulf %171, %172 : vector<8x32xf32>
    %174 = tpu.concatenate %74, %107, %140, %173 in 1 : vector<8x32xf32>, vector<8x32xf32>, vector<8x32xf32>, vector<8x32xf32> -> vector<8x128xf32>
    %c0_50 = arith.constant 0 : index
    %c0_51 = arith.constant 0 : index
    %175 = vector.load %arg5[%c0_50, %c0_51] : memref<8x128xf32, #tpu.memory_space<vmem>>, vector<8x128xf32>
    tpu.vector_store %arg5[%c0_50, %c0_51], %174 {strides = array<i32>} : memref<8x128xf32, #tpu.memory_space<vmem>>, vector<8x128xf32>,
    return
  }
  func.func @transform_0(%arg0: i32) -> (i32, i32) {
    %c0_i32 = arith.constant 0 : i32
    %c0_i32_0 = arith.constant 0 : i32
    return %arg0, %c0_i32 : i32, i32
  }
  func.func @transform_1(%arg0: i32) -> (i32, i32) {
    %c0_i32 = arith.constant 0 : i32
    %c0_i32_0 = arith.constant 0 : i32
    return %arg0, %c0_i32 : i32, i32
  }
  func.func @transform_2(%arg0: i32) -> (i32, i32) {
    %c0_i32 = arith.constant 0 : i32
    %c0_i32_0 = arith.constant 0 : i32
    return %arg0, %c0_i32 : i32, i32
  }
  func.func @transform_3(%arg0: i32) -> (i32, i32) {
    %c0_i32 = arith.constant 0 : i32
    %c0_i32_0 = arith.constant 0 : i32
    %c0_i32_1 = arith.constant 0 : i32
    return %c0_i32, %c0_i32_0 : i32, i32
  }
  func.func @transform_4(%arg0: i32) -> (i32, i32) {
    %c0_i32 = arith.constant 0 : i32
    %c0_i32_0 = arith.constant 0 : i32
    return %arg0, %c0_i32 : i32, i32
  }
}

</mosaic_0001>

<bundles_post_ra>
// kernel: tpu_custom_call.1
= control target key start
LH: loop header
LB: loop body
LE: loop exit
PB: predicated region body
PF: predicated region fallthrough
CT: control target
= control target key end

     0   :  { %9 = vsyncpa [#allocation3], 0  ;;  %s2708_s0 = inlined_call_operand.hbm [shape: f32[32,32], index: 0, kind: input, shape index: {}]   ;;  %s2709_s1 = inlined_call_operand.hbm [shape: f32[32,32], index: 1, kind: input, shape index: {}]   ;;  %s2710_s2 = inlined_call_operand.hbm [shape: f32[32,32], index: 2, kind: input, shape index: {}]   ;;  %s2711_s3 = inlined_call_operand.hbm [shape: f32[32,128], index: 3, kind: input, shape index: {}]   ;;  %s2712_s4 = inlined_call_operand.hbm [shape: f32[8,128], index: 4, kind: output, shape index: {}]  }
   0x1   :  { %10 = vsyncpa [#allocation6], 0 }
   0x2   :  { %11 = vsyncpa [#allocation9], 0 }
   0x3   :  { %12 = vsyncpa [#allocation4], 0  ;;  %s2353_s15 = smov [#allocation5]   ;;  %s2354_s17 = smov [#allocation2]  }
   0x4   :  { %s30_s16 = sshll.u32 %s2353_s15, 4  ;;  %s18_s18 = sshll.u32 %s2354_s17, 4  ;;  %s31_s16 = int_to_ptr.vmem [resolvable:$true] %s30_s16  ;;  %s19_s18 = int_to_ptr.vmem [resolvable:$true] %s18_s18 }
   0x5   :  { %s2253_s19 = scalar_lea.vmem %s31_s16, 512  ;;  %p2258_p1 = scmp.lt.s32.totalorder %s31_s16, %s31_s16 }
   0x6   :  { %p2254_p0 = scmp.ne.s32.totalorder %s31_s16, %s2253_s19  ;;  %p2259_p2 = scmp.lt.s32.totalorder %s2253_s19, %s2253_s19 }
   0x8   :  { %p2260_p3 = por %p2259_p2, %p2258_p1 }
   0xa   :  { %p2261_p4 = pnand %p2260_p3, %p2254_p0 }
   0xc   :  { %2264 = shalt.err (!%p2261_p4)
}
   0xd   :  { %s2355_s20 = smov 128   ;;  %s2356_s21 = smov 8  }
   0xe   :  { %36 = dma.hbm_to_vmem [thread:$0]  %s2709_s1, 512, %s31_s16, [#allocation6], %s2355_s20, %s2355_s20, %s2356_s21  }
   0xf   :  { %s2273_s24 = scalar_lea.vmem %s19_s18, 512  ;;  %p2278_p6 = scmp.lt.s32.totalorder %s19_s18, %s19_s18 }
  0x10   :  { %p2274_p5 = scmp.ne.s32.totalorder %s19_s18, %s2273_s24  ;;  %p2279_p7 = scmp.lt.s32.totalorder %s2273_s24, %s2273_s24 }
  0x12   :  { %p2280_p8 = por %p2279_p7, %p2278_p6 }
  0x14   :  { %p2281_p9 = pnand %p2280_p8, %p2274_p5 }
  0x16   :  { %2284 = shalt.err (!%p2281_p9)
}
  0x17   :  { %24 = dma.hbm_to_vmem [thread:$0]  %s2708_s0, 512, %s19_s18, [#allocation3], %s2355_s20, %s2355_s20, %s2356_s21  }
  0x18   :  { %s2357_s27 = smov [#allocation7]   ;;  %s2358_s29 = smov [#allocation8]  }
  0x19   :  { %s42_s28 = sshll.u32 %s2357_s27, 4  ;;  %s54_s30 = sshll.u32 %s2358_s29, 4  ;;  %s43_s28 = int_to_ptr.vmem [resolvable:$true] %s42_s28  ;;  %s55_s30 = int_to_ptr.vmem [resolvable:$true] %s54_s30 }
  0x1a   :  { %s2293_s1 = scalar_lea.vmem %s43_s28, 512  ;;  %p2298_p11 = scmp.lt.s32.totalorder %s43_s28, %s43_s28 }
  0x1b   :  { %p2294_p10 = scmp.ne.s32.totalorder %s43_s28, %s2293_s1  ;;  %p2299_p12 = scmp.lt.s32.totalorder %s2293_s1, %s2293_s1 }
  0x1d   :  { %p2300_p13 = por %p2299_p12, %p2298_p11 }
  0x1f   :  { %p2301_p0 = pnand %p2300_p13, %p2294_p10 }
  0x21   :  { %2304 = shalt.err (!%p2301_p0)
}
  0x22   :  { %48 = dma.hbm_to_vmem [thread:$0]  %s2710_s2, 512, %s43_s28, [#allocation6], %s2355_s20, %s2355_s20, %s2356_s21  }
  0x23   :  { %s2313_s0 = scalar_lea.vmem %s55_s30, 512  ;;  %p2318_p2 = scmp.lt.s32.totalorder %s55_s30, %s55_s30 }
  0x24   :  { %p2314_p1 = scmp.ne.s32.totalorder %s55_s30, %s2313_s0  ;;  %p2319_p3 = scmp.lt.s32.totalorder %s2313_s0, %s2313_s0 }
  0x26   :  { %p2320_p4 = por %p2319_p3, %p2318_p2 }
  0x28   :  { %p2321_p5 = pnand %p2320_p4, %p2314_p1 }
  0x2a   :  { %2324 = shalt.err (!%p2321_p5)
}
  0x2b   :  { %60 = dma.hbm_to_vmem [thread:$0]  %s2711_s3, 512, %s55_s30, [#allocation9], %s2355_s20, %s2355_s20, %s2356_s21  }
  0x2c   :  { %2345 = dma.done.wait [#allocation3], 512  }
  0x2d   :  { %2346 = vsyncadd [#allocation3], 4294966784 }
  0x2e   :  { %2347 = dma.done.wait [#allocation6], 1024  }
  0x2f   :  { %2348 = vsyncadd [#allocation6], 4294966272 }
  0x30   :  { %2349 = dma.done.wait [#allocation9], 512  }
  0x31   :  { %2350 = vsyncadd [#allocation9], 4294966784  ;;  %vm89_vm0 = vcmask 261120   ;;  %v88_v0 = vld [vmem:[#allocation8 + $0x18] sm:$0xff]  ;;  %v87_v1 = vld [vmem:[#allocation8 + $0x10] sm:$0xff]  ;;  %v324_v12 = vlaneseq  ;;  %vm432_vm2 = vcmask 64512  }
  0x32   :  { %1929 = vmatprep.subr.mxu0 %v88_v0  ;;  %v73_v2 = vld [vmem:[#allocation2] sm:$0xff]  ;;  %v86_v3 = vld [vmem:[#allocation8 + $0x8] sm:$0xff]  ;;  %v2417_v6 = vld [vmem:[#allocation2 + $0x10] sm:$0xff]  ;;  %vm2360_vm3 = vmmov 0   ;;  %s2361_s11 = smov 32   ;;  %s2362_s12 = smov 64  }
  0x33   :  { %1930 = vmatpush3.msra.mxu0 %v88_v0  ;;  %1937 = vmatprep.mubr.msk.f32.mxu0 %vm89_vm0, %v73_v2  ;;  %v85_v4 = vld [vmem:[#allocation8] sm:$0xff]  ;;  %v2415_v5 = vld [vmem:[#allocation2 + $0x8] sm:$0xff]  ;;  %v2423_v7 = vld [vmem:[#allocation2 + $0x18] sm:$0xff]  ;;  %v2437_v15 = vand.u32 127, %v324_v12  ;;  %v284_v22 = vmul.f32 %v73_v2, %v73_v2  ;;  %s2363_s13 = smov 96   ;;  %vm1679_vm4 = vcmask 523264  }
  0x34   :  { %1931 = vmatprep.subr.mxu0 %v87_v1  ;;  %v77_v8 = vld [vmem:[#allocation5] sm:$0xff]  ;;  %v78_v9 = vld [vmem:[#allocation5 + $0x8] sm:$0xff]  ;;  %v79_v35 = vld [vmem:[#allocation5 + $0x10] sm:$0xff]  ;;  %v285_v49 = vmul.f32 %v2415_v5, %v2415_v5  ;;  %s2364_s14 = smov [#allocation10]   ;;  %vm1681_vm5 = vcmask 785408  }
  0x35   :  { %1932 = vmatpush3.msra.mxu0 %v87_v1  ;;  %v304_v17 = vmul.f32 %v77_v8, %v77_v8  ;;  %vm326_vm1 = vcmp.lt.s32.totalorder %v2437_v15, 110  ;;  %v305_v21 = vmul.f32 %v78_v9, %v78_v9  ;;  %v288_v24 = vsel %vm89_vm0, %v284_v22, 0.0  ;;  %v2456_v44 = vld [vmem:[#allocation5 + $0x18] sm:$0xff]  ;;  %v81_v45 = vld [vmem:[#allocation7] sm:$0xff]  ;;  %s1690_s15 = sshll.u32 %s2364_s14, 4  ;;  %s1691_s15 = int_to_ptr.vmem [resolvable:$true] %s1690_s15 }
  0x36   :  { %1933 = vmatprep.subr.mxu0 %v86_v3  ;;  %v306_v46 = vmul.f32 %v79_v35, %v79_v35  ;;  %v291_v50 = vsel %vm89_vm0, %v285_v49, 0.0  ;;  %s2325_s16 = scalar_lea.vmem %s1691_s15, 128  ;;  %p2330_p7 = scmp.lt.s32.totalorder %s1691_s15, %s1691_s15 }
  0x37   :  { %1934 = vmatpush3.msra.mxu0 %v86_v3  ;;  %v308_v20 = vsel %vm89_vm0, %v304_v17, 0.0  ;;  %v311_v23 = vsel %vm89_vm0, %v305_v21, 0.0  ;;  %p2326_p6 = scmp.ne.s32.totalorder %s1691_s15, %s2325_s16  ;;  %p2331_p8 = scmp.lt.s32.totalorder %s2325_s16, %s2325_s16 }
  0x38   :  { %1935 = vmatprep.subr.mxu0 %v85_v4  ;;  %v314_v48 = vsel %vm89_vm0, %v306_v46, 0.0 }
  0x39   :  { %1936 = vmatpush3.msra.mxu0 %v85_v4  ;;  %p2332_p9 = por %p2331_p8, %p2330_p7 }
  0x3a   :  { %1938 = vmatmul.mubr.msk.f32.vlgmr.msra.gmra.mxu0 %vm89_vm0, %v2415_v5  ;;  %1943 = vmatprep.subr.mxu0 %v88_v0 }
  0x3b   :  { %1944 = vmatpush3.msra.mxu0 %v88_v0  ;;  %1940 = vmatprep.mubr.msk.f32.mxu0 %vm89_vm0, %v2417_v6  ;;  %p2333_p10 = pnand %p2332_p9, %p2326_p6 }
  0x3c   :  { %1945 = vmatprep.subr.mxu0 %v87_v1 }
  0x3d   :  { %1946 = vmatpush3.msra.mxu0 %v87_v1 }
  0x3e   :  { %1941 = vmatmul.mubr.msk.f32.gmra.mxu0 %vm89_vm0, %v2423_v7  ;;  %1947 = vmatprep.subr.mxu0 %v86_v3 }
  0x3f   :  { %1948 = vmatpush3.msra.mxu0 %v86_v3  ;;  %1951 = vmatprep.mubr.msk.f32.mxu0 %vm89_vm0, %v77_v8 }
  0x40   :  { %1949 = vmatprep.subr.mxu0 %v85_v4 }
  0x41   :  { %1950 = vmatpush3.msra.mxu0 %v85_v4 }
  0x42   :  { %1952 = vmatmul.mubr.msk.f32.vlgmr.msra.gmra.mxu0 %vm89_vm0, %v78_v9  ;;  %1957 = vmatprep.subr.mxu0 %v81_v45 }
  0x43   :  { %1954 = vmatprep.mubr.msk.f32.mxu0 %vm89_vm0, %v79_v35  ;;  %1958 = vmatpush3.msra.mxu0 %v81_v45 }
  0x46   :  { %1955 = vmatmul.mubr.msk.f32.gmra.mxu0 %vm89_vm0, %v2456_v44 }
  0xfa   :  { %v2429_v10 = vpop.f32.mrf.mxu0 }
  0xfb   :  { %v330_v51 = vsel %vm326_vm1, %v2429_v10, -inf }
  0xfc   :  { %v2431_v11 = vpop.f32.mrf.mxu0 }
  0xfd   :  { %v329_v25 = vsel %vm326_vm1, %v2431_v11, -inf }
  0xfe   :  { %v2433_v13 = vpop.f32.mrf.mxu0 }
 0x100   :  { %v2435_v14 = vpop.f32.mrf.mxu0 }
 0x102   :  { %v2439_v16 = vpop.f32.mrf.mxu0 }
 0x103   :  { %v370_v47 = vsel %vm326_vm1, %v2439_v16, -inf }
 0x104   :  { %v265_v18 = vpop.f32.mrf.mxu0 }
 0x105   :  { %v369_v19 = vsel %vm326_vm1, %v265_v18, -inf }
 0x106   :  { %373 = vmax.xlane.f32.xlu0 %v369_v19  ;;  %v2359_v19 = vmov 0.0  }
 0x107   :  { %1983 = vmatprep.subr.mxu1 %v2359_v19  ;;  %2044 = vmatprep.subr.mxu0 %v2359_v19 }
 0x108   :  { %2015 = vmatprep.mubr.msk.f32.mxu1 %vm2360_vm3, %v2359_v19 }
 0x10a   :  { %309 = vadd.xlane.f32.xlu0 %v308_v20 }
 0x10e   :  { %312 = vadd.xlane.f32.xlu0 %v311_v23 }
 0x112   :  { %289 = vadd.xlane.f32.xlu0 %v288_v24 }
 0x116   :  { %333 = vmax.xlane.f32.xlu0 %v329_v25 }
 0x18f   :  { %v374_v26 = vpop.xlane.xlu0 %373 }
 0x190   :  { %v375_v27 = vrot.slane %v374_v26, 4 }
 0x192   :  { %v376_v28 = vmax.f32 %v374_v26, %v375_v27  ;;  %v2493_v26 = vpop.f32.mrf.mxu0 }
 0x193   :  { %v310_v33 = vpop.xlane.xlu0 %309 }
 0x194   :  { %v377_v29 = vrot.slane %v376_v28, 2  ;;  %v320_v34 = vmul.f32 0.088388346, %v310_v33 }
 0x196   :  { %v378_v30 = vmax.f32 %v376_v28, %v377_v29  ;;  %v382_v36 = vsub.f32 %v265_v18, %v320_v34  ;;  %v2495_v28 = vpop.f32.mrf.mxu0 }
 0x197   :  { %v313_v20 = vpop.xlane.xlu0 %312 }
 0x198   :  { %v379_v31 = vrot.slane %v378_v30, 1  ;;  %v321_v21 = vmul.f32 0.088388346, %v313_v20 }
 0x19a   :  { %v380_v32 = vmax.f32 %v378_v30, %v379_v31  ;;  %v706_v22 = vsub.f32 %v2439_v16, %v321_v21 }
 0x19b   :  { %v290_v45 = vpop.xlane.xlu0 %289 }
 0x19c   :  { %2201 = vpush %v380_v32 }
 0x1cd   :  { %s2202_s2 = spop %2201 }
 0x1ce   :  { %v383_v37 = vstv %s2202_s2 }
 0x1cf   :  { %v384_v38 = vsub.f32 %v382_v36, %v383_v37 }
 0x1d1   :  { %v385_v39 = vmul.f32 1.442695, %v384_v38 }
 0x1d3   :  { %2221 = vpow2.f32 %v385_v39 }
 0x1e0   :  { %v2222_v40 = vpop.eup %2221 }
 0x1e1   :  { %v387_v41 = vadd.f32 0.0001, %v2222_v40 }
 0x1e3   :  { %v388_v42 = vmul.f32 0.09534626, %v387_v41 }
 0x1e5   :  { %v2453_v43 = vsel %vm326_vm1, %v388_v42, 0.0 }
 0x1e6   :  { %400 = vxpose.xlu1.b32.start.end [1/1] (short) %v2453_v43, 128 }
 0x249   :  { %697 = vmax.xlane.f32.xlu1 %v370_v47  ;;  %v300_v47 = vmul.f32 0.088388346, %v290_v45 }
 0x24b   :  { %v341_v49 = vsub.f32 %v2431_v11, %v300_v47 }
 0x24d   :  { %315 = vadd.xlane.f32.xlu1 %v314_v48 }
 0x251   :  { %292 = vadd.xlane.f32.xlu1 %v291_v50  ;;  %v334_v50 = vpop.xlane.xlu0 %333 }
 0x255   :  { %335 = vmax.xlane.f32.xlu1 %v330_v51 }
 0x262   :  { %v416_v52 = vpop.trf.xlu1 }
 0x263   :  { %1959 = vmatprep.mubr.msk.f32.mxu0 %vm432_vm2, %v416_v52  ;;  %v345_v52 = vsub.f32 %v341_v49, %v334_v50 }
 0x266   :  { %v417_v53 = vpop.trf.xlu1 }
 0x267   :  { %1960 = vmatmul.mubr.msk.f32.vlgmr.msra.gmra.mxu0 %vm432_vm2, %v417_v53 }
 0x26a   :  { %v418_v54 = vpop.trf.xlu1 }
 0x26b   :  { %1962 = vmatprep.mubr.msk.f32.mxu0 %vm432_vm2, %v418_v54  ;;  %v349_v54 = vmul.f32 1.442695, %v345_v52 }
 0x26e   :  { %v419_v55 = vpop.trf.xlu1 }
 0x26f   :  { %1963 = vmatmul.mubr.msk.f32.gmra.mxu0 %vm432_vm2, %v419_v55 }
 0x272   :  { %v420_v56 = vpop.trf.xlu1 }
 0x273   :  { %1965 = vmatprep.mubr.msk.f32.mxu0 %vm432_vm2, %v420_v56  ;;  %v82_v56 = vld [vmem:[#allocation7 + $0x8] sm:$0xff] }
 0x276   :  { %v421_v57 = vpop.trf.xlu1 }
 0x277   :  { %1966 = vmatmul.mubr.msk.f32.gmra.mxu0 %vm432_vm2, %v421_v57 }
 0x27a   :  { %v422_v58 = vpop.trf.xlu1 }
 0x27b   :  { %1968 = vmatprep.mubr.msk.f32.mxu0 %vm432_vm2, %v422_v58  ;;  %v307_v58 = vmul.f32 %v2456_v44, %v2456_v44 }
 0x27e   :  { %v423_v59 = vpop.trf.xlu1 }
 0x27f   :  { %1969 = vmatmul.mubr.msk.f32.gmra.mxu0 %vm432_vm2, %v423_v59  ;;  %v371_v59 = vsel %vm326_vm1, %v2495_v28, -inf }
 0x282   :  { %v424_v60 = vpop.trf.xlu1 }
 0x283   :  { %1971 = vmatprep.mubr.msk.f32.mxu0 %vm432_vm2, %v424_v60  ;;  %v317_v60 = vsel %vm89_vm0, %v307_v58, 0.0 }
 0x286   :  { %v425_v61 = vpop.trf.xlu1 }
 0x287   :  { %1972 = vmatmul.mubr.msk.f32.gmra.mxu0 %vm432_vm2, %v425_v61  ;;  %v286_v61 = vmul.f32 %v2417_v6, %v2417_v6 }
 0x28a   :  { %v426_v62 = vpop.trf.xlu1 }
 0x28b   :  { %1974 = vmatprep.mubr.msk.f32.mxu0 %vm432_vm2, %v426_v62  ;;  %v294_v62 = vsel %vm89_vm0, %v286_v61, 0.0 }
 0x28e   :  { %v427_v63 = vpop.trf.xlu1 }
 0x28f   :  { %1975 = vmatmul.mubr.msk.f32.gmra.mxu0 %vm432_vm2, %v427_v63  ;;  %v331_v63 = vsel %vm326_vm1, %v2435_v14, -inf }
 0x292   :  { %v428_v0 = vpop.trf.xlu1 }
 0x293   :  { %1977 = vmatprep.mubr.msk.f32.mxu0 %vm432_vm2, %v428_v0 }
 0x296   :  { %v429_v1 = vpop.trf.xlu1 }
 0x297   :  { %1978 = vmatmul.mubr.msk.f32.gmra.mxu0 %vm432_vm2, %v429_v1 }
 0x29a   :  { %v430_v2 = vpop.trf.xlu1 }
 0x29b   :  { %1980 = vmatprep.mubr.msk.f32.mxu0 %vm432_vm2, %v430_v2 }
 0x29e   :  { %v431_v3 = vpop.trf.xlu1 }
 0x29f   :  { %1981 = vmatmul.mubr.msk.f32.gmra.mxu0 %vm432_vm2, %v431_v3 }
 0x2a0   :  { %2076 = vmatprep.mubr.msk.f32.mxu0 %vm2360_vm3, %v2359_v19 }
 0x2d2   :  { %v698_v4 = vpop.xlane.xlu1 %697 }
 0x2d3   :  { %v699_v5 = vrot.slane %v698_v4, 4 }
 0x2d5   :  { %v700_v8 = vmax.f32 %v698_v4, %v699_v5 }
 0x2d7   :  { %v701_v9 = vrot.slane %v700_v8, 2 }
 0x2d9   :  { %v702_v12 = vmax.f32 %v700_v8, %v701_v9 }
 0x2db   :  { %v703_v17 = vrot.slane %v702_v12, 1 }
 0x2dd   :  { %v704_v18 = vmax.f32 %v702_v12, %v703_v17 }
 0x2df   :  { %2203 = vpush %v704_v18 }
 0x310   :  { %s2204_s3 = spop %2203 }
 0x311   :  { %v707_v23 = vstv %s2204_s3 }
 0x312   :  { %v708_v24 = vsub.f32 %v706_v22, %v707_v23 }
 0x314   :  { %v709_v25 = vmul.f32 1.442695, %v708_v24 }
 0x316   :  { %2223 = vpow2.f32 %v709_v25 }
 0x317   :  { %2225 = vpow2.f32 %v349_v54 }
 0x323   :  { %v2224_v27 = vpop.eup %2223 }
 0x324   :  { %v711_v29 = vadd.f32 0.0001, %v2224_v27  ;;  %v2226_v11 = vpop.eup %2225 }
 0x325   :  { %v357_v55 = vadd.f32 0.0001, %v2226_v11 }
 0x326   :  { %v712_v30 = vmul.f32 0.09534626, %v711_v29 }
 0x327   :  { %v1961_v31 = vpop.f32.mrf.mxu0  ;;  %v2517_v57 = vmul.f32 0.09534626, %v357_v55 }
 0x328   :  { %v2499_v32 = vsel %vm326_vm1, %v712_v30, 0.0 }
 0x329   :  { %724 = vxpose.xlu0.b32.start.end [1/1] (short) %v2499_v32, 128  ;;  %v547_v16 = vpop.f32.mrf.mxu0 }
 0x32f   :  { %v1964_v33 = vpop.f32.mrf.mxu0 }
 0x331   :  { %v557_v34 = vpop.f32.mrf.mxu0 }
 0x337   :  { %v1967_v35 = vpop.f32.mrf.mxu0 }
 0x339   :  { %v567_v36 = vpop.f32.mrf.mxu0 }
 0x33f   :  { %v1970_v37 = vpop.f32.mrf.mxu0 }
 0x341   :  { %v577_v38 = vpop.f32.mrf.mxu0 }
 0x347   :  { %v1973_v39 = vpop.f32.mrf.mxu0 }
 0x349   :  { %v587_v40 = vpop.f32.mrf.mxu0 }
 0x34f   :  { %v1976_v41 = vpop.f32.mrf.mxu0 }
 0x351   :  { %v597_v42 = vpop.f32.mrf.mxu0 }
 0x357   :  { %v1979_v46 = vpop.f32.mrf.mxu0 }
 0x359   :  { %v607_v48 = vpop.f32.mrf.mxu0 }
 0x35f   :  { %v1982_v51 = vpop.f32.mrf.mxu0 }
 0x360   :  { %1984 = vmatpush3.msra.mxu1 %v1982_v51 }
 0x361   :  { %v617_v53 = vpop.f32.mrf.mxu0  ;;  %1985 = vmatprep.subr.mxu1 %v2359_v19 }
 0x362   :  { %1986 = vmatpush3.msra.mxu1 %v617_v53 }
 0x363   :  { %1987 = vmatprep.subr.mxu1 %v2359_v19 }
 0x364   :  { %1988 = vmatpush3.msra.mxu1 %v1979_v46 }
 0x365   :  { %1989 = vmatprep.subr.mxu1 %v2359_v19 }
 0x366   :  { %1990 = vmatpush3.msra.mxu1 %v607_v48 }
 0x367   :  { %1991 = vmatprep.subr.mxu1 %v2359_v19 }
 0x368   :  { %1992 = vmatpush3.msra.mxu1 %v1976_v41 }
 0x369   :  { %1993 = vmatprep.subr.mxu1 %v2359_v19 }
 0x36a   :  { %1994 = vmatpush3.msra.mxu1 %v597_v42 }
 0x36b   :  { %1995 = vmatprep.subr.mxu1 %v2359_v19 }
 0x36c   :  { %1996 = vmatpush3.msra.mxu1 %v1973_v39 }
 0x36d   :  { %1997 = vmatprep.subr.mxu1 %v2359_v19 }
 0x36e   :  { %1998 = vmatpush3.msra.mxu1 %v587_v40 }
 0x36f   :  { %1999 = vmatprep.subr.mxu1 %v2359_v19 }
 0x370   :  { %2000 = vmatpush3.msra.mxu1 %v1970_v37 }
 0x371   :  { %2001 = vmatprep.subr.mxu1 %v2359_v19 }
 0x372   :  { %2002 = vmatpush3.msra.mxu1 %v577_v38 }
 0x373   :  { %2003 = vmatprep.subr.mxu1 %v2359_v19 }
 0x374   :  { %2004 = vmatpush3.msra.mxu1 %v1967_v35 }
 0x375   :  { %2005 = vmatprep.subr.mxu1 %v2359_v19 }
 0x376   :  { %2006 = vmatpush3.msra.mxu1 %v567_v36 }
 0x377   :  { %2007 = vmatprep.subr.mxu1 %v2359_v19 }
 0x378   :  { %2008 = vmatpush3.msra.mxu1 %v1964_v33 }
 0x379   :  { %2009 = vmatprep.subr.mxu1 %v2359_v19 }
 0x37a   :  { %2010 = vmatpush3.msra.mxu1 %v557_v34  ;;  %v316_v34 = vpop.xlane.xlu1 %315 }
 0x37b   :  { %2011 = vmatprep.subr.mxu1 %v2359_v19  ;;  %v322_v35 = vmul.f32 0.088388346, %v316_v34 }
 0x37c   :  { %2012 = vmatpush3.msra.mxu1 %v1961_v31 }
 0x37d   :  { %2013 = vmatprep.subr.mxu1 %v2359_v19  ;;  %v1029_v36 = vsub.f32 %v2495_v28, %v322_v35 }
 0x37e   :  { %2014 = vmatpush3.msra.mxu1 %v547_v16 }
 0x37f   :  { %2016 = vmatmul.mubr.msk.f32.vlgmr.msra.gmra.mxu1 %vm326_vm1, %v2517_v57  ;;  %2018 = vmatprep.subr.mxu1 %v82_v56 }
 0x380   :  { %2019 = vmatpush3.msra.mxu1 %v82_v56  ;;  %v293_v56 = vpop.xlane.xlu1 %292 }
 0x381   :  { %2105 = vmatprep.subr.mxu1 %v2359_v19 }
 0x392   :  { %1020 = vmax.xlane.f32.xlu0 %v371_v59  ;;  %v301_v59 = vmul.f32 0.088388346, %v293_v56 }
 0x394   :  { %v342_v61 = vsub.f32 %v2429_v10, %v301_v59 }
 0x396   :  { %318 = vadd.xlane.f32.xlu0 %v317_v60 }
 0x39a   :  { %295 = vadd.xlane.f32.xlu0 %v294_v62  ;;  %v336_v62 = vpop.xlane.xlu1 %335 }
 0x39e   :  { %337 = vmax.xlane.f32.xlu0 %v331_v63 }
 0x3a5   :  { %v740_v44 = vpop.trf.xlu0 }
 0x3a6   :  { %2020 = vmatprep.mubr.msk.f32.mxu1 %vm432_vm2, %v740_v44  ;;  %v346_v44 = vsub.f32 %v342_v61, %v336_v62 }
 0x3a9   :  { %v741_v0 = vpop.trf.xlu0 }
 0x3aa   :  { %2021 = vmatmul.mubr.msk.f32.vlgmr.msra.gmra.mxu1 %vm432_vm2, %v741_v0 }
 0x3ad   :  { %v742_v1 = vpop.trf.xlu0 }
 0x3ae   :  { %2023 = vmatprep.mubr.msk.f32.mxu1 %vm432_vm2, %v742_v1  ;;  %v351_v1 = vmul.f32 1.442695, %v346_v44 }
 0x3b1   :  { %v743_v2 = vpop.trf.xlu0 }
 0x3b2   :  { %2024 = vmatmul.mubr.msk.f32.gmra.mxu1 %vm432_vm2, %v743_v2 }
 0x3b5   :  { %v744_v6 = vpop.trf.xlu0 }
 0x3b6   :  { %2026 = vmatprep.mubr.msk.f32.mxu1 %vm432_vm2, %v744_v6 }
 0x3b9   :  { %v745_v3 = vpop.trf.xlu0 }
 0x3ba   :  { %2027 = vmatmul.mubr.msk.f32.gmra.mxu1 %vm432_vm2, %v745_v3 }
 0x3bd   :  { %v746_v4 = vpop.trf.xlu0 }
 0x3be   :  { %2029 = vmatprep.mubr.msk.f32.mxu1 %vm432_vm2, %v746_v4 }
 0x3c1   :  { %v747_v5 = vpop.trf.xlu0 }
 0x3c2   :  { %2030 = vmatmul.mubr.msk.f32.gmra.mxu1 %vm432_vm2, %v747_v5 }
 0x3c5   :  { %v748_v8 = vpop.trf.xlu0 }
 0x3c6   :  { %2032 = vmatprep.mubr.msk.f32.mxu1 %vm432_vm2, %v748_v8 }
 0x3c9   :  { %v749_v9 = vpop.trf.xlu0 }
 0x3ca   :  { %2033 = vmatmul.mubr.msk.f32.gmra.mxu1 %vm432_vm2, %v749_v9 }
 0x3cd   :  { %v750_v12 = vpop.trf.xlu0 }
 0x3ce   :  { %2035 = vmatprep.mubr.msk.f32.mxu1 %vm432_vm2, %v750_v12  ;;  %v83_v12 = vld [vmem:[#allocation7 + $0x10] sm:$0xff] }
 0x3d1   :  { %v751_v17 = vpop.trf.xlu0 }
 0x3d2   :  { %2036 = vmatmul.mubr.msk.f32.gmra.mxu1 %vm432_vm2, %v751_v17 }
 0x3d5   :  { %v752_v18 = vpop.trf.xlu0 }
 0x3d6   :  { %2038 = vmatprep.mubr.msk.f32.mxu1 %vm432_vm2, %v752_v18  ;;  %v714_v18 = vrot.slane %v2499_v32, 4 }
 0x3d9   :  { %v753_v20 = vpop.trf.xlu0 }
 0x3da   :  { %2039 = vmatmul.mubr.msk.f32.gmra.mxu1 %vm432_vm2, %v753_v20  ;;  %v715_v20 = vadd.f32 %v714_v18, %v2499_v32  ;;  %v332_v32 = vsel %vm326_vm1, %v2433_v13, -inf }
 0x3dd   :  { %v754_v21 = vpop.trf.xlu0 }
 0x3de   :  { %2041 = vmatprep.mubr.msk.f32.mxu1 %vm432_vm2, %v754_v21 }
 0x3e1   :  { %v755_v22 = vpop.trf.xlu0 }
 0x3e2   :  { %2042 = vmatmul.mubr.msk.f32.gmra.mxu1 %vm432_vm2, %v755_v22  ;;  %v716_v22 = vrot.slane %v715_v20, 2 }
 0x3e3   :  { %2137 = vmatprep.mubr.msk.f32.mxu1 %vm2360_vm3, %v2359_v19 }
 0x41b   :  { %v1021_v23 = vpop.xlane.xlu0 %1020 }
 0x41c   :  { %v1022_v24 = vrot.slane %v1021_v23, 4 }
 0x41e   :  { %v1023_v25 = vmax.f32 %v1021_v23, %v1022_v24 }
 0x41f   :  { %v2572_v10 = vpop.xlane.xlu0 %318 }
 0x420   :  { %v1024_v27 = vrot.slane %v1023_v25, 2 }
 0x422   :  { %v1025_v29 = vmax.f32 %v1023_v25, %v1024_v27  ;;  %v717_v25 = vadd.f32 %v716_v22, %v715_v20 }
 0x423   :  { %v296_v2 = vpop.xlane.xlu0 %295 }
 0x424   :  { %v1026_v30 = vrot.slane %v1025_v29, 1  ;;  %v302_v6 = vmul.f32 0.088388346, %v296_v2 }
 0x426   :  { %v1027_v31 = vmax.f32 %v1025_v29, %v1026_v30  ;;  %v343_v4 = vsub.f32 %v2435_v14, %v302_v6  ;;  %v718_v29 = vrot.slane %v717_v25, 1  ;;  %v323_v6 = vmul.f32 0.088388346, %v2572_v10 }
 0x427   :  { %v338_v5 = vpop.xlane.xlu0 %337 }
 0x428   :  { %2205 = vpush %v1027_v31  ;;  %v347_v9 = vsub.f32 %v343_v4, %v338_v5  ;;  %v372_v31 = vsel %vm326_vm1, %v2493_v26, -inf  ;;  %v719_v34 = vadd.f32 %v718_v29, %v717_v25 }
 0x42a   :  { %v353_v14 = vmul.f32 1.442695, %v347_v9 }
 0x43f   :  { %v2554_v16 = vpop.f32.mrf.mxu1 }
 0x441   :  { %v2017_v33 = vpop.f32.mrf.mxu1 }
 0x459   :  { %s2206_s9 = spop %2205 }
 0x45a   :  { %v1030_v37 = vstv %s2206_s9 }
 0x45b   :  { %v1031_v38 = vsub.f32 %v1029_v36, %v1030_v37 }
 0x45d   :  { %v1032_v39 = vmul.f32 1.442695, %v1031_v38 }
 0x45f   :  { %2227 = vpow2.f32 %v1032_v39 }
 0x460   :  { %2229 = vpow2.f32 %v351_v1 }
 0x461   :  { %2231 = vpow2.f32 %v353_v14 }
 0x46a   :  { %v2557_v40 = vpop.f32.mrf.mxu1 }
 0x46c   :  { %v2228_v41 = vpop.eup %2227  ;;  %v2559_v45 = vpop.f32.mrf.mxu1 }
 0x46d   :  { %v1034_v42 = vadd.f32 0.0001, %v2228_v41  ;;  %v2230_v3 = vpop.eup %2229 }
 0x46e   :  { %v358_v8 = vadd.f32 0.0001, %v2230_v3  ;;  %v2232_v27 = vpop.eup %2231  ;;  %v1352_v3 = vsub.f32 %v2493_v26, %v323_v6 }
 0x46f   :  { %v1035_v46 = vmul.f32 0.09534626, %v1034_v42  ;;  %v359_v33 = vadd.f32 0.0001, %v2232_v27 }
 0x470   :  { %v362_v17 = vmul.f32 0.09534626, %v358_v8 }
 0x471   :  { %v2563_v47 = vsel %vm326_vm1, %v1035_v46, 0.0  ;;  %v2602_v37 = vmul.f32 0.09534626, %v359_v33 }
 0x472   :  { %1047 = vxpose.xlu1.b32.start.end [1/1] (short) %v2563_v47, 128  ;;  %v2025_v48 = vpop.f32.mrf.mxu1  ;;  %v1037_v21 = vrot.slane %v2563_v47, 4  ;;  %v366_v36 = vsel %vm326_vm1, %v362_v17, 0.0 }
 0x473   :  { %v720_v38 = vmul.f32 %v719_v34, %v366_v36  ;;  %v287_v36 = vmul.f32 %v2423_v7, %v2423_v7 }
 0x474   :  { %v880_v28 = vpop.f32.mrf.mxu1  ;;  %v1038_v23 = vadd.f32 %v1037_v21, %v2563_v47 }
 0x476   :  { %v1039_v24 = vrot.slane %v1038_v23, 2 }
 0x478   :  { %v1040_v30 = vadd.f32 %v1039_v24, %v1038_v23 }
 0x47a   :  { %v2028_v49 = vpop.f32.mrf.mxu1  ;;  %v1041_v35 = vrot.slane %v1040_v30, 1 }
 0x47c   :  { %v890_v50 = vpop.f32.mrf.mxu1  ;;  %v1042_v39 = vadd.f32 %v1041_v35, %v1040_v30 }
 0x482   :  { %v2031_v51 = vpop.f32.mrf.mxu1 }
 0x484   :  { %v900_v52 = vpop.f32.mrf.mxu1 }
 0x48a   :  { %v2034_v53 = vpop.f32.mrf.mxu1 }
 0x48c   :  { %v910_v54 = vpop.f32.mrf.mxu1 }
 0x492   :  { %v2037_v11 = vpop.f32.mrf.mxu1 }
 0x494   :  { %v920_v55 = vpop.f32.mrf.mxu1 }
 0x49a   :  { %v2040_v58 = vpop.f32.mrf.mxu1 }
 0x49c   :  { %v930_v60 = vpop.f32.mrf.mxu1 }
 0x4a2   :  { %v2043_v63 = vpop.f32.mrf.mxu1 }
 0x4a3   :  { %2045 = vmatpush3.msra.mxu0 %v2043_v63 }
 0x4a4   :  { %v940_v0 = vpop.f32.mrf.mxu1  ;;  %2046 = vmatprep.subr.mxu0 %v2359_v19 }
 0x4a5   :  { %2047 = vmatpush3.msra.mxu0 %v940_v0 }
 0x4a6   :  { %2048 = vmatprep.subr.mxu0 %v2359_v19 }
 0x4a7   :  { %2049 = vmatpush3.msra.mxu0 %v2040_v58 }
 0x4a8   :  { %2050 = vmatprep.subr.mxu0 %v2359_v19 }
 0x4a9   :  { %2051 = vmatpush3.msra.mxu0 %v930_v60 }
 0x4aa   :  { %2052 = vmatprep.subr.mxu0 %v2359_v19 }
 0x4ab   :  { %2053 = vmatpush3.msra.mxu0 %v2037_v11 }
 0x4ac   :  { %2054 = vmatprep.subr.mxu0 %v2359_v19 }
 0x4ad   :  { %2055 = vmatpush3.msra.mxu0 %v920_v55 }
 0x4ae   :  { %2056 = vmatprep.subr.mxu0 %v2359_v19 }
 0x4af   :  { %2057 = vmatpush3.msra.mxu0 %v2034_v53 }
 0x4b0   :  { %2058 = vmatprep.subr.mxu0 %v2359_v19 }
 0x4b1   :  { %2059 = vmatpush3.msra.mxu0 %v910_v54 }
 0x4b2   :  { %2060 = vmatprep.subr.mxu0 %v2359_v19 }
 0x4b3   :  { %2061 = vmatpush3.msra.mxu0 %v2031_v51 }
 0x4b4   :  { %2062 = vmatprep.subr.mxu0 %v2359_v19 }
 0x4b5   :  { %2063 = vmatpush3.msra.mxu0 %v900_v52 }
 0x4b6   :  { %2064 = vmatprep.subr.mxu0 %v2359_v19 }
 0x4b7   :  { %2065 = vmatpush3.msra.mxu0 %v2028_v49 }
 0x4b8   :  { %2066 = vmatprep.subr.mxu0 %v2359_v19 }
 0x4b9   :  { %2067 = vmatpush3.msra.mxu0 %v890_v50 }
 0x4ba   :  { %2068 = vmatprep.subr.mxu0 %v2359_v19 }
 0x4bb   :  { %2069 = vmatpush3.msra.mxu0 %v2025_v48 }
 0x4bc   :  { %2070 = vmatprep.subr.mxu0 %v2359_v19 }
 0x4bd   :  { %2071 = vmatpush3.msra.mxu0 %v880_v28 }
 0x4be   :  { %2072 = vmatprep.subr.mxu0 %v2359_v19 }
 0x4bf   :  { %2073 = vmatpush3.msra.mxu0 %v2557_v40  ;;  %v367_v40 = vsel %vm326_vm1, %v2602_v37, 0.0 }
 0x4c0   :  { %2074 = vmatprep.subr.mxu0 %v2359_v19  ;;  %v1043_v41 = vmul.f32 %v1042_v39, %v367_v40 }
 0x4c1   :  { %2075 = vmatpush3.msra.mxu0 %v2559_v45 }
 0x4c2   :  { %2077 = vmatmul.mubr.msk.f32.vlgmr.msra.gmra.mxu0 %vm326_vm1, %v362_v17  ;;  %2079 = vmatprep.subr.mxu0 %v83_v12 }
 0x4c3   :  { %2080 = vmatpush3.msra.mxu0 %v83_v12 }
 0x4c4   :  { %2166 = vmatprep.subr.mxu0 %v2359_v19 }
 0x4d5   :  { %1343 = vmax.xlane.f32.xlu1 %v372_v31 }
 0x4d9   :  { %339 = vmax.xlane.f32.xlu1 %v332_v32  ;;  %v84_v32 = vld [vmem:[#allocation7 + $0x18] sm:$0xff] }
 0x4dd   :  { %721 = vadd.xlane.f32.xlu1 %v720_v38  ;;  %v297_v38 = vsel %vm89_vm0, %v287_v36, 0.0 }
 0x4e1   :  { %1044 = vadd.xlane.f32.xlu1 %v1043_v41 }
 0x4ee   :  { %v1063_v42 = vpop.trf.xlu1 }
 0x4ef   :  { %2081 = vmatprep.mubr.msk.f32.mxu0 %vm432_vm2, %v1063_v42 }
 0x4f2   :  { %v1064_v45 = vpop.trf.xlu1 }
 0x4f3   :  { %2082 = vmatmul.mubr.msk.f32.vlgmr.msra.gmra.mxu0 %vm432_vm2, %v1064_v45 }
 0x4f6   :  { %v1065_v46 = vpop.trf.xlu1 }
 0x4f7   :  { %2084 = vmatprep.mubr.msk.f32.mxu0 %vm432_vm2, %v1065_v46 }
 0x4fa   :  { %v1066_v47 = vpop.trf.xlu1 }
 0x4fb   :  { %2085 = vmatmul.mubr.msk.f32.gmra.mxu0 %vm432_vm2, %v1066_v47 }
 0x4fe   :  { %v1067_v48 = vpop.trf.xlu1 }
 0x4ff   :  { %2087 = vmatprep.mubr.msk.f32.mxu0 %vm432_vm2, %v1067_v48 }
 0x502   :  { %v1068_v28 = vpop.trf.xlu1 }
 0x503   :  { %2088 = vmatmul.mubr.msk.f32.gmra.mxu0 %vm432_vm2, %v1068_v28 }
 0x506   :  { %v1069_v49 = vpop.trf.xlu1 }
 0x507   :  { %2090 = vmatprep.mubr.msk.f32.mxu0 %vm432_vm2, %v1069_v49 }
 0x50a   :  { %v1070_v50 = vpop.trf.xlu1 }
 0x50b   :  { %2091 = vmatmul.mubr.msk.f32.gmra.mxu0 %vm432_vm2, %v1070_v50 }
 0x50e   :  { %v1071_v51 = vpop.trf.xlu1 }
 0x50f   :  { %2093 = vmatprep.mubr.msk.f32.mxu0 %vm432_vm2, %v1071_v51 }
 0x512   :  { %v1072_v52 = vpop.trf.xlu1 }
 0x513   :  { %2094 = vmatmul.mubr.msk.f32.gmra.mxu0 %vm432_vm2, %v1072_v52 }
 0x516   :  { %v1073_v53 = vpop.trf.xlu1 }
 0x517   :  { %2096 = vmatprep.mubr.msk.f32.mxu0 %vm432_vm2, %v1073_v53 }
 0x51a   :  { %v1074_v54 = vpop.trf.xlu1 }
 0x51b   :  { %2097 = vmatmul.mubr.msk.f32.gmra.mxu0 %vm432_vm2, %v1074_v54 }
 0x51e   :  { %v1075_v11 = vpop.trf.xlu1 }
 0x51f   :  { %2099 = vmatprep.mubr.msk.f32.mxu0 %vm432_vm2, %v1075_v11 }
 0x522   :  { %v1076_v55 = vpop.trf.xlu1 }
 0x523   :  { %2100 = vmatmul.mubr.msk.f32.gmra.mxu0 %vm432_vm2, %v1076_v55 }
 0x526   :  { %v1077_v56 = vpop.trf.xlu1 }
 0x527   :  { %2102 = vmatprep.mubr.msk.f32.mxu0 %vm432_vm2, %v1077_v56 }
 0x52a   :  { %v1078_v58 = vpop.trf.xlu1 }
 0x52b   :  { %2103 = vmatmul.mubr.msk.f32.gmra.mxu0 %vm432_vm2, %v1078_v58 }
 0x52c   :  { %2198 = vmatprep.mubr.msk.f32.mxu0 %vm2360_vm3, %v2359_v19 }
 0x55e   :  { %v1344_v59 = vpop.xlane.xlu1 %1343 }
 0x55f   :  { %v1345_v60 = vrot.slane %v1344_v59, 4 }
 0x561   :  { %v1346_v61 = vmax.f32 %v1344_v59, %v1345_v60 }
 0x562   :  { %v340_v56 = vpop.xlane.xlu1 %339 }
 0x563   :  { %v1347_v62 = vrot.slane %v1346_v61, 2 }
 0x565   :  { %v1348_v63 = vmax.f32 %v1346_v61, %v1347_v62  ;;  %v390_v61 = vrot.slane %v2453_v43, 4 }
 0x567   :  { %v1349_v44 = vrot.slane %v1348_v63, 1 }
 0x569   :  { %v1350_v0 = vmax.f32 %v1348_v63, %v1349_v44  ;;  %v391_v63 = vadd.f32 %v390_v61, %v2453_v43  ;;  %v365_v43 = vsel %vm326_vm1, %v2517_v57, 0.0 }
 0x56b   :  { %2207 = vpush %v1350_v0  ;;  %v392_v0 = vrot.slane %v391_v63, 2 }
 0x56d   :  { %v393_v6 = vadd.f32 %v392_v0, %v391_v63 }
 0x582   :  { %v2625_v1 = vpop.f32.mrf.mxu0 }
 0x584   :  { %v2078_v2 = vpop.f32.mrf.mxu0 }
 0x59c   :  { %s2208_s10 = spop %2207 }
 0x59d   :  { %v1353_v4 = vstv %s2208_s10 }
 0x59e   :  { %v1354_v5 = vsub.f32 %v1352_v3, %v1353_v4 }
 0x5a0   :  { %v1355_v8 = vmul.f32 1.442695, %v1354_v5 }
 0x5a2   :  { %2233 = vpow2.f32 %v1355_v8 }
 0x5af   :  { %v2234_v9 = vpop.eup %2233 }
 0x5b0   :  { %v1357_v12 = vadd.f32 0.0001, %v2234_v9 }
 0x5b2   :  { %v1358_v17 = vmul.f32 0.09534626, %v1357_v12 }
 0x5b3   :  { %v2083_v14 = vpop.f32.mrf.mxu0 }
 0x5b4   :  { %v2631_v18 = vsel %vm326_vm1, %v1358_v17, 0.0 }
 0x5b5   :  { %1370 = vxpose.xlu0.b32.start.end [1/1] (short) %v2631_v18, 128  ;;  %v1193_v20 = vpop.f32.mrf.mxu0  ;;  %v1360_v59 = vrot.slane %v2631_v18, 4 }
 0x5b7   :  { %v1361_v62 = vadd.f32 %v1360_v59, %v2631_v18  ;;  %v722_v18 = vpop.xlane.xlu1 %721 }
 0x5b9   :  { %v1362_v44 = vrot.slane %v1361_v62, 2 }
 0x5bb   :  { %v2086_v21 = vpop.f32.mrf.mxu0  ;;  %v1363_v2 = vadd.f32 %v1362_v44, %v1361_v62 }
 0x5bd   :  { %v1203_v10 = vpop.f32.mrf.mxu0  ;;  %v1364_v4 = vrot.slane %v1363_v2, 1 }
 0x5bf   :  { %v1365_v9 = vadd.f32 %v1364_v4, %v1363_v2 }
 0x5c3   :  { %v2089_v22 = vpop.f32.mrf.mxu0 }
 0x5c5   :  { %v1213_v26 = vpop.f32.mrf.mxu0 }
 0x5cb   :  { %v2092_v23 = vpop.f32.mrf.mxu0 }
 0x5cd   :  { %v1223_v24 = vpop.f32.mrf.mxu0 }
 0x5d3   :  { %v2095_v25 = vpop.f32.mrf.mxu0 }
 0x5d5   :  { %v1233_v27 = vpop.f32.mrf.mxu0 }
 0x5db   :  { %v2098_v29 = vpop.f32.mrf.mxu0 }
 0x5dd   :  { %v1243_v30 = vpop.f32.mrf.mxu0 }
 0x5e3   :  { %v2101_v31 = vpop.f32.mrf.mxu0 }
 0x5e5   :  { %v1253_v33 = vpop.f32.mrf.mxu0 }
 0x5eb   :  { %v2104_v34 = vpop.f32.mrf.mxu0 }
 0x5ec   :  { %2106 = vmatpush3.msra.mxu1 %v2104_v34 }
 0x5ed   :  { %v1263_v35 = vpop.f32.mrf.mxu0  ;;  %2107 = vmatprep.subr.mxu1 %v2359_v19 }
 0x5ee   :  { %2108 = vmatpush3.msra.mxu1 %v1263_v35 }
 0x5ef   :  { %2109 = vmatprep.subr.mxu1 %v2359_v19 }
 0x5f0   :  { %2110 = vmatpush3.msra.mxu1 %v2101_v31 }
 0x5f1   :  { %2111 = vmatprep.subr.mxu1 %v2359_v19 }
 0x5f2   :  { %2112 = vmatpush3.msra.mxu1 %v1253_v33 }
 0x5f3   :  { %2113 = vmatprep.subr.mxu1 %v2359_v19 }
 0x5f4   :  { %2114 = vmatpush3.msra.mxu1 %v2098_v29 }
 0x5f5   :  { %2115 = vmatprep.subr.mxu1 %v2359_v19 }
 0x5f6   :  { %2116 = vmatpush3.msra.mxu1 %v1243_v30 }
 0x5f7   :  { %2117 = vmatprep.subr.mxu1 %v2359_v19 }
 0x5f8   :  { %2118 = vmatpush3.msra.mxu1 %v2095_v25 }
 0x5f9   :  { %2119 = vmatprep.subr.mxu1 %v2359_v19 }
 0x5fa   :  { %2120 = vmatpush3.msra.mxu1 %v1233_v27 }
 0x5fb   :  { %2121 = vmatprep.subr.mxu1 %v2359_v19 }
 0x5fc   :  { %2122 = vmatpush3.msra.mxu1 %v2092_v23 }
 0x5fd   :  { %2123 = vmatprep.subr.mxu1 %v2359_v19 }
 0x5fe   :  { %2124 = vmatpush3.msra.mxu1 %v1223_v24 }
 0x5ff   :  { %2125 = vmatprep.subr.mxu1 %v2359_v19 }
 0x600   :  { %2126 = vmatpush3.msra.mxu1 %v2089_v22 }
 0x601   :  { %2127 = vmatprep.subr.mxu1 %v2359_v19 }
 0x602   :  { %2128 = vmatpush3.msra.mxu1 %v1213_v26 }
 0x603   :  { %2129 = vmatprep.subr.mxu1 %v2359_v19 }
 0x604   :  { %2130 = vmatpush3.msra.mxu1 %v2086_v21  ;;  %v1045_v21 = vpop.xlane.xlu1 %1044 }
 0x605   :  { %2131 = vmatprep.subr.mxu1 %v2359_v19 }
 0x606   :  { %2132 = vmatpush3.msra.mxu1 %v1203_v10 }
 0x607   :  { %2133 = vmatprep.subr.mxu1 %v2359_v19 }
 0x608   :  { %2134 = vmatpush3.msra.mxu1 %v2083_v14 }
 0x609   :  { %2135 = vmatprep.subr.mxu1 %v2359_v19 }
 0x60a   :  { %2136 = vmatpush3.msra.mxu1 %v1193_v20 }
 0x60b   :  { %2138 = vmatmul.mubr.msk.f32.vlgmr.msra.gmra.mxu1 %vm326_vm1, %v2602_v37  ;;  %2140 = vmatprep.subr.mxu1 %v84_v32 }
 0x60c   :  { %2141 = vmatpush3.msra.mxu1 %v84_v32 }
 0x61e   :  { %298 = vadd.xlane.f32.xlu0 %v297_v38 }
 0x631   :  { %v1386_v39 = vpop.trf.xlu0 }
 0x632   :  { %2142 = vmatprep.mubr.msk.f32.mxu1 %vm432_vm2, %v1386_v39 }
 0x635   :  { %v1387_v40 = vpop.trf.xlu0 }
 0x636   :  { %2143 = vmatmul.mubr.msk.f32.vlgmr.msra.gmra.mxu1 %vm432_vm2, %v1387_v40 }
 0x639   :  { %v1388_v41 = vpop.trf.xlu0 }
 0x63a   :  { %2145 = vmatprep.mubr.msk.f32.mxu1 %vm432_vm2, %v1388_v41 }
 0x63d   :  { %v1389_v42 = vpop.trf.xlu0 }
 0x63e   :  { %2146 = vmatmul.mubr.msk.f32.gmra.mxu1 %vm432_vm2, %v1389_v42 }
 0x641   :  { %v1390_v37 = vpop.trf.xlu0 }
 0x642   :  { %2148 = vmatprep.mubr.msk.f32.mxu1 %vm432_vm2, %v1390_v37 }
 0x645   :  { %v1391_v45 = vpop.trf.xlu0 }
 0x646   :  { %2149 = vmatmul.mubr.msk.f32.gmra.mxu1 %vm432_vm2, %v1391_v45 }
 0x649   :  { %v1392_v7 = vpop.trf.xlu0 }
 0x64a   :  { %2151 = vmatprep.mubr.msk.f32.mxu1 %vm432_vm2, %v1392_v7 }
 0x64d   :  { %v1393_v46 = vpop.trf.xlu0 }
 0x64e   :  { %2152 = vmatmul.mubr.msk.f32.gmra.mxu1 %vm432_vm2, %v1393_v46 }
 0x651   :  { %v1394_v47 = vpop.trf.xlu0 }
 0x652   :  { %2154 = vmatprep.mubr.msk.f32.mxu1 %vm432_vm2, %v1394_v47 }
 0x655   :  { %v1395_v48 = vpop.trf.xlu0 }
 0x656   :  { %2155 = vmatmul.mubr.msk.f32.gmra.mxu1 %vm432_vm2, %v1395_v48 }
 0x659   :  { %v1396_v28 = vpop.trf.xlu0 }
 0x65a   :  { %2157 = vmatprep.mubr.msk.f32.mxu1 %vm432_vm2, %v1396_v28 }
 0x65d   :  { %v1397_v49 = vpop.trf.xlu0 }
 0x65e   :  { %2158 = vmatmul.mubr.msk.f32.gmra.mxu1 %vm432_vm2, %v1397_v49 }
 0x661   :  { %v1398_v50 = vpop.trf.xlu0 }
 0x662   :  { %2160 = vmatprep.mubr.msk.f32.mxu1 %vm432_vm2, %v1398_v50 }
 0x665   :  { %v1399_v51 = vpop.trf.xlu0 }
 0x666   :  { %2161 = vmatmul.mubr.msk.f32.gmra.mxu1 %vm432_vm2, %v1399_v51 }
 0x669   :  { %v1400_v52 = vpop.trf.xlu0 }
 0x66a   :  { %2163 = vmatprep.mubr.msk.f32.mxu1 %vm432_vm2, %v1400_v52 }
 0x66d   :  { %v1401_v53 = vpop.trf.xlu0 }
 0x66e   :  { %2164 = vmatmul.mubr.msk.f32.gmra.mxu1 %vm432_vm2, %v1401_v53 }
 0x6a7   :  { %v299_v54 = vpop.xlane.xlu0 %298 }
 0x6a8   :  { %v303_v11 = vmul.f32 0.088388346, %v299_v54 }
 0x6aa   :  { %v344_v55 = vsub.f32 %v2433_v13, %v303_v11  ;;  %v394_v13 = vrot.slane %v393_v6, 1 }
 0x6ac   :  { %v348_v58 = vsub.f32 %v344_v55, %v340_v56  ;;  %v395_v14 = vadd.f32 %v394_v13, %v393_v6 }
 0x6ae   :  { %v355_v60 = vmul.f32 1.442695, %v348_v58  ;;  %v396_v20 = vmul.f32 %v395_v14, %v365_v43 }
 0x6b0   :  { %2235 = vpow2.f32 %v355_v60 }
 0x6b1   :  { %2237 = vrcp.f32 %v722_v18 }
 0x6b2   :  { %2239 = vrcp.f32 %v1045_v21 }
 0x6bd   :  { %v2236_v3 = vpop.eup %2235 }
 0x6be   :  { %v360_v5 = vadd.f32 0.0001, %v2236_v3  ;;  %v2238_v26 = vpop.eup %2237 }
 0x6bf   :  { %v1019_v23 = vmul.f32 %v2238_v26, %v2625_v1  ;;  %v2240_v24 = vpop.eup %2239 }
 0x6c0   :  { %v2676_v8 = vmul.f32 0.09534626, %v360_v5 }
 0x6c2   :  { %v368_v12 = vsel %vm326_vm1, %v2676_v8, 0.0 }
 0x6c3   :  { %v1366_v17 = vmul.f32 %v1365_v9, %v368_v12 }
 0x6c5   :  { %1367 = vadd.xlane.f32.xlu1 %v1366_v17 }
 0x6c9   :  { %397 = vadd.xlane.f32.xlu1 %v396_v20 }
 0x6cb   :  { %v1338_v10 = vpop.f32.mrf.mxu1 }
 0x6cc   :  { %v1342_v25 = vmul.f32 %v2240_v24, %v1338_v10 }
 0x6cd   :  { %v2139_v22 = vpop.f32.mrf.mxu1 }
 0x6da   :  { %1667 = vrot.lane.b32.xlu1 %v1019_v23, %s2361_s11 }
 0x6de   :  { %1671 = vrot.lane.b32.xlu1 %v1342_v25, %s2362_s12 }
 0x6f6   :  { %v2144_v27 = vpop.f32.mrf.mxu1 }
 0x6f8   :  { %v1516_v29 = vpop.f32.mrf.mxu1 }
 0x6fe   :  { %v2147_v30 = vpop.f32.mrf.mxu1 }
 0x700   :  { %v1526_v57 = vpop.f32.mrf.mxu1 }
 0x706   :  { %v2150_v31 = vpop.f32.mrf.mxu1 }
 0x708   :  { %v1536_v33 = vpop.f32.mrf.mxu1 }
 0x70e   :  { %v2153_v34 = vpop.f32.mrf.mxu1 }
 0x710   :  { %v1546_v35 = vpop.f32.mrf.mxu1 }
 0x716   :  { %v2156_v32 = vpop.f32.mrf.mxu1 }
 0x718   :  { %v1556_v36 = vpop.f32.mrf.mxu1 }
 0x71e   :  { %v2159_v38 = vpop.f32.mrf.mxu1 }
 0x720   :  { %v1566_v39 = vpop.f32.mrf.mxu1 }
 0x726   :  { %v2162_v40 = vpop.f32.mrf.mxu1 }
 0x728   :  { %v1576_v1 = vpop.f32.mrf.mxu1 }
 0x72e   :  { %v2165_v41 = vpop.f32.mrf.mxu1 }
 0x72f   :  { %2167 = vmatpush3.msra.mxu0 %v2165_v41 }
 0x730   :  { %v1586_v42 = vpop.f32.mrf.mxu1  ;;  %2168 = vmatprep.subr.mxu0 %v2359_v19 }
 0x731   :  { %2169 = vmatpush3.msra.mxu0 %v1586_v42 }
 0x732   :  { %2170 = vmatprep.subr.mxu0 %v2359_v19 }
 0x733   :  { %2171 = vmatpush3.msra.mxu0 %v2162_v40 }
 0x734   :  { %2172 = vmatprep.subr.mxu0 %v2359_v19 }
 0x735   :  { %2173 = vmatpush3.msra.mxu0 %v1576_v1 }
 0x736   :  { %2174 = vmatprep.subr.mxu0 %v2359_v19 }
 0x737   :  { %2175 = vmatpush3.msra.mxu0 %v2159_v38 }
 0x738   :  { %2176 = vmatprep.subr.mxu0 %v2359_v19 }
 0x739   :  { %2177 = vmatpush3.msra.mxu0 %v1566_v39 }
 0x73a   :  { %2178 = vmatprep.subr.mxu0 %v2359_v19 }
 0x73b   :  { %2179 = vmatpush3.msra.mxu0 %v2156_v32 }
 0x73c   :  { %2180 = vmatprep.subr.mxu0 %v2359_v19 }
 0x73d   :  { %2181 = vmatpush3.msra.mxu0 %v1556_v36 }
 0x73e   :  { %2182 = vmatprep.subr.mxu0 %v2359_v19 }
 0x73f   :  { %2183 = vmatpush3.msra.mxu0 %v2153_v34 }
 0x740   :  { %2184 = vmatprep.subr.mxu0 %v2359_v19 }
 0x741   :  { %2185 = vmatpush3.msra.mxu0 %v1546_v35 }
 0x742   :  { %2186 = vmatprep.subr.mxu0 %v2359_v19 }
 0x743   :  { %2187 = vmatpush3.msra.mxu0 %v2150_v31 }
 0x744   :  { %2188 = vmatprep.subr.mxu0 %v2359_v19 }
 0x745   :  { %2189 = vmatpush3.msra.mxu0 %v1536_v33 }
 0x746   :  { %2190 = vmatprep.subr.mxu0 %v2359_v19 }
 0x747   :  { %2191 = vmatpush3.msra.mxu0 %v2147_v30 }
 0x748   :  { %2192 = vmatprep.subr.mxu0 %v2359_v19 }
 0x749   :  { %2193 = vmatpush3.msra.mxu0 %v1526_v57 }
 0x74a   :  { %2194 = vmatprep.subr.mxu0 %v2359_v19 }
 0x74b   :  { %2195 = vmatpush3.msra.mxu0 %v2144_v27 }
 0x74c   :  { %2196 = vmatprep.subr.mxu0 %v2359_v19 }
 0x74d   :  { %2197 = vmatpush3.msra.mxu0 %v1516_v29 }
 0x74e   :  { %2199 = vmatmul.mubr.msk.f32.vlgmr.msra.gmra.mxu0 %vm326_vm1, %v2676_v8  ;;  %v1368_v37 = vpop.xlane.xlu1 %1367 }
 0x74f   :  { %2241 = vrcp.f32 %v1368_v37 }
 0x752   :  { %v398_v48 = vpop.xlane.xlu1 %397 }
 0x753   :  { %2243 = vrcp.f32 %v398_v48 }
 0x756   :  { %v1668_v49 = vpop.permute.xlu1 %1667 }
 0x75a   :  { %v1672_v19 = vpop.permute.xlu1 %1671 }
 0x75c   :  { %v2242_v45 = vpop.eup %2241 }
 0x760   :  { %v2244_v28 = vpop.eup %2243 }
 0x761   :  { %v696_v50 = vmul.f32 %v2244_v28, %v2554_v16 }
 0x763   :  { %v1678_v51 = vsel %vm89_vm0, %v696_v50, %v1668_v49 }
 0x764   :  { %v1680_v15 = vsel %vm1679_vm4, %v1678_v51, %v1672_v19 }
 0x80e   :  { %v1661_v7 = vpop.f32.mrf.mxu0 }
 0x80f   :  { %v1665_v46 = vmul.f32 %v2242_v45, %v1661_v7 }
 0x810   :  { %v2200_v47 = vpop.f32.mrf.mxu0 }
 0x811   :  { %1675 = vrot.lane.b32.xlu1 %v1665_v46, %s2363_s13 }
 0x883   :  { %v1676_v52 = vpop.permute.xlu1 %1675 }
 0x884   :  { %v1682_v53 = vsel %vm1681_vm5, %v1680_v15, %v1676_v52 }
 0x885   :  { %1683 = vst [vmem:[#allocation10] sm:$0xff] %v1682_v53 }
 0x886   :  { %2336 = shalt.err (!%p2333_p10)
}
 0x887   :  { %1693 = dma.vmem_to_hbm [thread:$0]  %s1691_s15, 128, %s2712_s4, [#allocation4]  }
 0x888   :  { %2351 = dma.done.wait [#allocation4], 128  }
 0x889   :  { %2352 = vsyncadd [#allocation4], 4294967168 }
 0x88a   :  { %1697 = vsyncpa [#allocation3], 1 }
 0x88b   :  { %1698 = vsyncpa [#allocation6], 1 }
 0x88c   :  { %1699 = vsyncpa [#allocation9], 1 }
 0x88d   :  { %1700 = vsyncpa [#allocation4], 1 }

</bundles_post_ra>
